<compile_context>
chip_gen: v5e
topology: v5e:2x2
jax: 0.10.0
libtpu: 0.0.40
codegen_flags: <defaults>
</compile_context>

<pallas_src>
import functools

import jax
import jax.numpy as jnp
from jax import lax
from jax.experimental import pallas as pl
from jax.experimental.pallas import tpu as pltpu


def _round_up(v, m):
    return (v + m - 1) // m * m


# ----------------------------------------------------------------------------
# Kernel 1/2: fused [optional BN-affine + ReLU prologue] -> replicate pad ->
# 3x3 conv as a single im2col matmul -> bias, plus per-step partial BN sums.
# Grid iterates (in parallel) over the batch dimension.
# ----------------------------------------------------------------------------
def _conv_kernel(x_ref, w_ref, b_ref, scale_ref, shift_ref,
                 y_ref, sum_ref, sumsq_ref, *, H, W, cin, prologue):
    a = x_ref[0][..., :cin].astype(jnp.float32)            # (H, W, cin)

    if prologue:
        # Fused BatchNorm (pre-folded scale/shift) + ReLU on the input tile.
        sc = scale_ref[...][:, :cin]                        # (1, cin)
        sh = shift_ref[...][:, :cin]
        a = jnp.maximum(a * sc + sh, 0.0)

    # Replicate padding (padding=1, padding_mode='replicate') in-kernel.
    a = jnp.concatenate([a[0:1], a, a[H - 1:H]], axis=0)            # (H+2, W, cin)
    a = jnp.concatenate([a[:, 0:1], a, a[:, W - 1:W]], axis=1)      # (H+2, W+2, cin)

    # Build the im2col slab once and do ONE matmul with K = 9*cin.
    taps = [a[dy:dy + H, dx:dx + W, :] for dy in range(3) for dx in range(3)]
    patches = jnp.concatenate(taps, axis=-1)                # (H, W, 9*cin)
    patches = patches.reshape(H * W, 9 * cin)               # free: W % 8 == 0
    acc = jnp.dot(patches, w_ref[...],
                  preferred_element_type=jnp.float32)       # (H*W, Cp) lane-dense
    acc = acc + b_ref[...]                                  # (1, Cp) broadcast

    y_ref[0] = acc.reshape(H, W, acc.shape[-1]).astype(y_ref.dtype)

    # Per-grid-step partial BN statistics (reduced outside the kernel so the
    # batch axis can stay "parallel").
    sum_ref[...] = acc.sum(axis=0, keepdims=True)[None]
    sumsq_ref[...] = (acc * acc).sum(axis=0, keepdims=True)[None]


def conv3x3_fused(x, w2d, b, scale, shift, *, cin, cout_p, prologue):
    """x: (N, H, W, Cs) NHWC; w2d: (9*cin, Cp); b/scale/shift: (1, Cp)."""
    N, H, W, Cs = x.shape
    K = w2d.shape[0]
    kernel = functools.partial(_conv_kernel, H=H, W=W, cin=cin,
                               prologue=prologue)
    return pl.pallas_call(
        kernel,
        out_shape=(
            jax.ShapeDtypeStruct((N, H, W, cout_p), jnp.float32),
            jax.ShapeDtypeStruct((N, 1, cout_p), jnp.float32),
            jax.ShapeDtypeStruct((N, 1, cout_p), jnp.float32),
        ),
        grid=(N,),
        in_specs=[
            pl.BlockSpec((1, H, W, Cs), lambda n: (n, 0, 0, 0)),
            pl.BlockSpec((K, cout_p), lambda n: (0, 0)),
            pl.BlockSpec((1, cout_p), lambda n: (0, 0)),
            pl.BlockSpec((1, cout_p), lambda n: (0, 0)),
            pl.BlockSpec((1, cout_p), lambda n: (0, 0)),
        ],
        out_specs=(
            pl.BlockSpec((1, H, W, cout_p), lambda n: (n, 0, 0, 0)),
            pl.BlockSpec((1, 1, cout_p), lambda n: (n, 0, 0)),
            pl.BlockSpec((1, 1, cout_p), lambda n: (n, 0, 0)),
        ),
        compiler_params=pltpu.CompilerParams(
            dimension_semantics=("parallel",)),
    )(x, w2d, b, scale, shift)


# ----------------------------------------------------------------------------
# Kernel 3: final BN affine + ReLU as a lane-dense 2D elementwise slab.
# ----------------------------------------------------------------------------
def _bn_relu_kernel(y_ref, scale_ref, shift_ref, o_ref):
    o_ref[...] = jnp.maximum(y_ref[...] * scale_ref[...] + shift_ref[...], 0.0)


def bn_relu_2d(yflat, scale, shift, *, rows_per_block):
    R, Cp = yflat.shape
    return pl.pallas_call(
        _bn_relu_kernel,
        out_shape=jax.ShapeDtypeStruct((R, Cp), jnp.float32),
        grid=(R // rows_per_block,),
        in_specs=[
            pl.BlockSpec((rows_per_block, Cp), lambda i: (i, 0)),
            pl.BlockSpec((1, Cp), lambda i: (0, 0)),
            pl.BlockSpec((1, Cp), lambda i: (0, 0)),
        ],
        out_specs=pl.BlockSpec((rows_per_block, Cp), lambda i: (i, 0)),
        compiler_params=pltpu.CompilerParams(
            dimension_semantics=("parallel",)),
    )(yflat, scale, shift)


# ----------------------------------------------------------------------------
# BN folding helper: reduce per-step partials, fold into scale/shift.
# ----------------------------------------------------------------------------
def _bn_fold(psum, psumsq, gamma_p, beta_p, count, eps):
    s = psum.sum(axis=0)[0]                         # (Cp,)
    ss = psumsq.sum(axis=0)[0]
    mean = s / count
    var = jnp.maximum(ss / count - mean * mean, 0.0)   # clamp: guards cancellation
    scale = gamma_p[0] * lax.rsqrt(var + eps)
    shift = beta_p[0] - mean * scale
    return scale.reshape(1, -1), shift.reshape(1, -1)


# ----------------------------------------------------------------------------
# DoubleConv forward (PyTorch module in training mode: BN uses batch stats
# with biased variance, eps=1e-5; conv uses replicate padding=1).
# ----------------------------------------------------------------------------
def double_conv(x_nchw, params, eps=1e-5):
    w1, b1, g1, be1, w2, b2, g2, be2 = params
    N, Cin, H, W = x_nchw.shape
    Cout = w1.shape[-1]
    Cp = _round_up(Cout, 128)                       # lane-dense channel padding
    count = float(N * H * W)

    def pad_c(a):                                   # pad last dim to Cp
        return jnp.pad(a, [(0, 0)] * (a.ndim - 1) + [(0, Cp - a.shape[-1])])

    # Weight / parameter prep (host side, tiny): fold 3x3 taps into (9*Cin, Cp).
    w1d = pad_c(w1).reshape(9 * Cin, Cp).astype(jnp.float32)
    w2d = pad_c(w2).reshape(9 * Cout, Cp).astype(jnp.float32)
    b1p = pad_c(b1.reshape(1, Cout)).astype(jnp.float32)
    b2p = pad_c(b2.reshape(1, Cout)).astype(jnp.float32)
    g1p, be1p = pad_c(g1.reshape(1, Cout)), pad_c(be1.reshape(1, Cout))
    g2p, be2p = pad_c(g2.reshape(1, Cout)), pad_c(be2.reshape(1, Cout))
    ones = jnp.ones((1, Cp), jnp.float32)
    zeros = jnp.zeros((1, Cp), jnp.float32)

    x = jnp.transpose(x_nchw, (0, 2, 3, 1)).astype(jnp.float32)     # NCHW -> NHWC

    # conv1 (padding + conv fused; BN1/ReLU deferred into conv2's prologue)
    y1, s1, ss1 = conv3x3_fused(x, w1d, b1p, ones, zeros,
                                cin=Cin, cout_p=Cp, prologue=False)
    sc1, sh1 = _bn_fold(s1, ss1, g1p, be1p, count, eps)

    # conv2 with fused BN1-affine + ReLU prologue and in-kernel replicate pad
    y2, s2, ss2 = conv3x3_fused(y1, w2d, b2p, sc1, sh1,
                                cin=Cout, cout_p=Cp, prologue=True)
    sc2, sh2 = _bn_fold(s2, ss2, g2p, be2p, count, eps)

    # final BN2 + ReLU on a lane-dense 2D view
    out = bn_relu_2d(y2.reshape(N * H * W, Cp), sc2, sh2, rows_per_block=H * W)
    out = out.reshape(N, H, W, Cp)[..., :Cout]
    return jnp.transpose(out, (0, 3, 1, 2))                          # NHWC -> NCHW


# ----------------------------------------------------------------------------
# Pure-JAX reference for correctness checking.
# ----------------------------------------------------------------------------
def ref_double_conv(x_nchw, params, eps=1e-5):
    w1, b1, g1, be1, w2, b2, g2, be2 = params
    x = jnp.transpose(x_nchw, (0, 2, 3, 1)).astype(jnp.float32)

    def conv(x, w, b):
        xp = jnp.pad(x, ((0, 0), (1, 1), (1, 1), (0, 0)), mode="edge")
        y = lax.conv_general_dilated(
            xp, w, window_strides=(1, 1), padding="VALID",
            dimension_numbers=("NHWC", "HWIO", "NHWC"))
        return y + b

    def bnr(y, g, be):
        mean = y.mean(axis=(0, 1, 2))
        var = y.var(axis=(0, 1, 2))
        return jnp.maximum((y - mean) / jnp.sqrt(var + eps) * g + be, 0.0)

    y = bnr(conv(x, w1, b1), g1, be1)
    y = bnr(conv(y, w2, b2), g2, be2)
    return jnp.transpose(y, (0, 3, 1, 2))


if __name__ == "__main__":
    key = jax.random.PRNGKey(0)
    N, in_ch, out_ch, H, W = 2, 4, 8, 16, 16

    k_x, k_w1, k_b1, k_w2, k_b2 = jax.random.split(key, 5)
    x = jax.random.normal(k_x, (N, in_ch, H, W), jnp.float32)

    # Conv weights in HWIO; BN gamma=1, beta=0 (PyTorch defaults).
    w1 = 0.1 * jax.random.normal(k_w1, (3, 3, in_ch, out_ch), jnp.float32)
    b1 = 0.1 * jax.random.normal(k_b1, (out_ch,), jnp.float32)
    g1 = jnp.ones((out_ch,), jnp.float32)
    be1 = jnp.zeros((out_ch,), jnp.float32)
    w2 = 0.1 * jax.random.normal(k_w2, (3, 3, out_ch, out_ch), jnp.float32)
    b2 = 0.1 * jax.random.normal(k_b2, (out_ch,), jnp.float32)
    g2 = jnp.ones((out_ch,), jnp.float32)
    be2 = jnp.zeros((out_ch,), jnp.float32)
    params = (w1, b1, g1, be1, w2, b2, g2, be2)

    out = jax.block_until_ready(double_conv(x, params))
    ref = jax.block_until_ready(ref_double_conv(x, params))

    assert out.shape == (N, out_ch, H, W), out.shape
    assert jnp.allclose(out, ref, atol=1e-3, rtol=1e-3), float(
        jnp.max(jnp.abs(out - ref)))

    print("KERNEL_OK")
</pallas_src>

<mosaic_0001>
module attributes {stable_mosaic.version = 11 : i64} {
  func.func @_conv_kernel(%arg0: i32, %arg1: memref<1x16x16x4xf32, #tpu.memory_space<vmem>>, %arg2: memref<36x128xf32, #tpu.memory_space<vmem>>, %arg3: memref<1x128xf32, #tpu.memory_space<vmem>>, %arg4: memref<1x128xf32, #tpu.memory_space<vmem>>, %arg5: memref<1x128xf32, #tpu.memory_space<vmem>>, %arg6: memref<1x16x16x128xf32, #tpu.memory_space<vmem>>, %arg7: memref<1x1x128xf32, #tpu.memory_space<vmem>>, %arg8: memref<1x1x128xf32, #tpu.memory_space<vmem>>) attributes {dimension_semantics = [#tpu.dimension_semantics<parallel>], iteration_bounds = array<i64: 2>, scalar_prefetch = 0 : i64, scratch_operands = 0 : i64, tpu.core_type = #tpu.core_type<tc>, window_params = [{transform_indices = @transform_0, window_bounds = array<i64: 1, 16, 16, 4>}, {pipeline_mode = #tpu.pipeline_mode<synchronous>, transform_indices = @transform_1, window_bounds = array<i64: 36, 128>}, {pipeline_mode = #tpu.pipeline_mode<synchronous>, transform_indices = @transform_2, window_bounds = array<i64: 1, 128>}, {pipeline_mode = #tpu.pipeline_mode<synchronous>, transform_indices = @transform_3, window_bounds = array<i64: 1, 128>}, {pipeline_mode = #tpu.pipeline_mode<synchronous>, transform_indices = @transform_4, window_bounds = array<i64: 1, 128>}, {transform_indices = @transform_5, window_bounds = array<i64: 1, 16, 16, 128>}, {transform_indices = @transform_6, window_bounds = array<i64: 1, 1, 128>}, {transform_indices = @transform_7, window_bounds = array<i64: 1, 1, 128>}]} {
    %c0 = arith.constant 0 : index
    %c0_0 = arith.constant 0 : index
    %c0_1 = arith.constant 0 : index
    %c0_2 = arith.constant 0 : index
    %0 = vector.load %arg1[%c0, %c0_0, %c0_1, %c0_2] : memref<1x16x16x4xf32, #tpu.memory_space<vmem>>, vector<1x16x16x4xf32>
    %1 = vector.shape_cast %0 : vector<1x16x16x4xf32> to vector<16x16x4xf32>
    %2 = vector.extract_strided_slice %1 {offsets = [0, 0, 0], sizes = [1, 16, 4], strides = [1, 1, 1]} : vector<16x16x4xf32> to vector<1x16x4xf32>
    %3 = vector.extract_strided_slice %1 {offsets = [15, 0, 0], sizes = [1, 16, 4], strides = [1, 1, 1]} : vector<16x16x4xf32> to vector<1x16x4xf32>
    %4 = tpu.concatenate %2, %1, %3 in 0 : vector<1x16x4xf32>, vector<16x16x4xf32>, vector<1x16x4xf32> -> vector<18x16x4xf32>
    %5 = vector.extract_strided_slice %4 {offsets = [0, 0, 0], sizes = [18, 1, 4], strides = [1, 1, 1]} : vector<18x16x4xf32> to vector<18x1x4xf32>
    %6 = vector.extract_strided_slice %4 {offsets = [0, 15, 0], sizes = [18, 1, 4], strides = [1, 1, 1]} : vector<18x16x4xf32> to vector<18x1x4xf32>
    %7 = tpu.concatenate %5, %4, %6 in 1 : vector<18x1x4xf32>, vector<18x16x4xf32>, vector<18x1x4xf32> -> vector<18x18x4xf32>
    %8 = vector.extract_strided_slice %7 {offsets = [0, 0, 0], sizes = [16, 16, 4], strides = [1, 1, 1]} : vector<18x18x4xf32> to vector<16x16x4xf32>
    %9 = vector.extract_strided_slice %7 {offsets = [0, 1, 0], sizes = [16, 16, 4], strides = [1, 1, 1]} : vector<18x18x4xf32> to vector<16x16x4xf32>
    %10 = vector.extract_strided_slice %7 {offsets = [0, 2, 0], sizes = [16, 16, 4], strides = [1, 1, 1]} : vector<18x18x4xf32> to vector<16x16x4xf32>
    %11 = vector.extract_strided_slice %7 {offsets = [1, 0, 0], sizes = [16, 16, 4], strides = [1, 1, 1]} : vector<18x18x4xf32> to vector<16x16x4xf32>
    %12 = vector.extract_strided_slice %7 {offsets = [1, 1, 0], sizes = [16, 16, 4], strides = [1, 1, 1]} : vector<18x18x4xf32> to vector<16x16x4xf32>
    %13 = vector.extract_strided_slice %7 {offsets = [1, 2, 0], sizes = [16, 16, 4], strides = [1, 1, 1]} : vector<18x18x4xf32> to vector<16x16x4xf32>
    %14 = vector.extract_strided_slice %7 {offsets = [2, 0, 0], sizes = [16, 16, 4], strides = [1, 1, 1]} : vector<18x18x4xf32> to vector<16x16x4xf32>
    %15 = vector.extract_strided_slice %7 {offsets = [2, 1, 0], sizes = [16, 16, 4], strides = [1, 1, 1]} : vector<18x18x4xf32> to vector<16x16x4xf32>
    %16 = vector.extract_strided_slice %7 {offsets = [2, 2, 0], sizes = [16, 16, 4], strides = [1, 1, 1]} : vector<18x18x4xf32> to vector<16x16x4xf32>
    %17 = tpu.concatenate %8, %9, %10, %11, %12, %13, %14, %15, %16 in 2 : vector<16x16x4xf32>, vector<16x16x4xf32>, vector<16x16x4xf32>, vector<16x16x4xf32>, vector<16x16x4xf32>, vector<16x16x4xf32>, vector<16x16x4xf32>, vector<16x16x4xf32>, vector<16x16x4xf32> -> vector<16x16x36xf32>
    %18 = vector.shape_cast %17 : vector<16x16x36xf32> to vector<256x36xf32>
    %c0_3 = arith.constant 0 : index
    %c0_4 = arith.constant 0 : index
    %19 = vector.load %arg2[%c0_3, %c0_4] : memref<36x128xf32, #tpu.memory_space<vmem>>, vector<36x128xf32>
    %cst = arith.constant dense<0.000000e+00> : vector<256x128xf32>
    %20 = tpu.matmul %18, %19, %cst {dimension_numbers = #tpu.dot_dimension_numbers<[1], [0], [0], [1], [0, 0, 1, 1], [], []>} : vector<256x36xf32>, vector<36x128xf32>, vector<256x128xf32> -> vector<256x128xf32>
    %c0_5 = arith.constant 0 : index
    %c0_6 = arith.constant 0 : index
    %21 = vector.load %arg3[%c0_5, %c0_6] : memref<1x128xf32, #tpu.memory_space<vmem>>, vector<1x128xf32>
    %22 = vector.broadcast %21 : vector<1x128xf32> to vector<256x128xf32>
    %23 = arith.addf %20, %22 : vector<256x128xf32>
    %24 = vector.shape_cast %23 : vector<256x128xf32> to vector<16x16x128xf32>
    %c0_7 = arith.constant 0 : index
    %c0_8 = arith.constant 0 : index
    %c0_9 = arith.constant 0 : index
    %c0_10 = arith.constant 0 : index
    %25 = vector.load %arg6[%c0_7, %c0_8, %c0_9, %c0_10] : memref<1x16x16x128xf32, #tpu.memory_space<vmem>>, vector<1x16x16x128xf32>
    %26 = vector.shape_cast %25 : vector<1x16x16x128xf32> to vector<16x16x128xf32>
    %27 = vector.shape_cast %24 : vector<16x16x128xf32> to vector<1x16x16x128xf32>
    tpu.vector_store %arg6[%c0_7, %c0_8, %c0_9, %c0_10], %27 {strides = array<i32>} : memref<1x16x16x128xf32, #tpu.memory_space<vmem>>, vector<1x16x16x128xf32>,
    %cst_11 = arith.constant dense<0.000000e+00> : vector<128xf32>
    %28 = vector.multi_reduction <add>, %23, %cst_11 [0] : vector<256x128xf32> to vector<128xf32>
    %29 = vector.shape_cast %28 : vector<128xf32> to vector<1x128xf32>
    %30 = vector.shape_cast %29 : vector<1x128xf32> to vector<1x1x128xf32>
    %c0_12 = arith.constant 0 : index
    %c0_13 = arith.constant 0 : index
    %c0_14 = arith.constant 0 : index
    %31 = vector.load %arg7[%c0_12, %c0_13, %c0_14] : memref<1x1x128xf32, #tpu.memory_space<vmem>>, vector<1x1x128xf32>
    tpu.vector_store %arg7[%c0_12, %c0_13, %c0_14], %30 {strides = array<i32>} : memref<1x1x128xf32, #tpu.memory_space<vmem>>, vector<1x1x128xf32>,
    %32 = arith.mulf %23, %23 : vector<256x128xf32>
    %cst_15 = arith.constant dense<0.000000e+00> : vector<128xf32>
    %33 = vector.multi_reduction <add>, %32, %cst_15 [0] : vector<256x128xf32> to vector<128xf32>
    %34 = vector.shape_cast %33 : vector<128xf32> to vector<1x128xf32>
    %35 = vector.shape_cast %34 : vector<1x128xf32> to vector<1x1x128xf32>
    %c0_16 = arith.constant 0 : index
    %c0_17 = arith.constant 0 : index
    %c0_18 = arith.constant 0 : index
    %36 = vector.load %arg8[%c0_16, %c0_17, %c0_18] : memref<1x1x128xf32, #tpu.memory_space<vmem>>, vector<1x1x128xf32>
    tpu.vector_store %arg8[%c0_16, %c0_17, %c0_18], %35 {strides = array<i32>} : memref<1x1x128xf32, #tpu.memory_space<vmem>>, vector<1x1x128xf32>,
    return
  }
  func.func @transform_0(%arg0: i32) -> (i32, i32, i32, i32) {
    %c0_i32 = arith.constant 0 : i32
    %c0_i32_0 = arith.constant 0 : i32
    %c0_i32_1 = arith.constant 0 : i32
    %c0_i32_2 = arith.constant 0 : i32
    return %arg0, %c0_i32, %c0_i32_0, %c0_i32_1 : i32, i32, i32, i32
  }
  func.func @transform_1(%arg0: i32) -> (i32, i32) {
    %c0_i32 = arith.constant 0 : i32
    %c0_i32_0 = arith.constant 0 : i32
    %c0_i32_1 = arith.constant 0 : i32
    return %c0_i32, %c0_i32_0 : i32, i32
  }
  func.func @transform_2(%arg0: i32) -> (i32, i32) {
    %c0_i32 = arith.constant 0 : i32
    %c0_i32_0 = arith.constant 0 : i32
    %c0_i32_1 = arith.constant 0 : i32
    return %c0_i32, %c0_i32_0 : i32, i32
  }
  func.func @transform_3(%arg0: i32) -> (i32, i32) {
    %c0_i32 = arith.constant 0 : i32
    %c0_i32_0 = arith.constant 0 : i32
    %c0_i32_1 = arith.constant 0 : i32
    return %c0_i32, %c0_i32_0 : i32, i32
  }
  func.func @transform_4(%arg0: i32) -> (i32, i32) {
    %c0_i32 = arith.constant 0 : i32
    %c0_i32_0 = arith.constant 0 : i32
    %c0_i32_1 = arith.constant 0 : i32
    return %c0_i32, %c0_i32_0 : i32, i32
  }
  func.func @transform_5(%arg0: i32) -> (i32, i32, i32, i32) {
    %c0_i32 = arith.constant 0 : i32
    %c0_i32_0 = arith.constant 0 : i32
    %c0_i32_1 = arith.constant 0 : i32
    %c0_i32_2 = arith.constant 0 : i32
    return %arg0, %c0_i32, %c0_i32_0, %c0_i32_1 : i32, i32, i32, i32
  }
  func.func @transform_6(%arg0: i32) -> (i32, i32, i32) {
    %c0_i32 = arith.constant 0 : i32
    %c0_i32_0 = arith.constant 0 : i32
    %c0_i32_1 = arith.constant 0 : i32
    return %arg0, %c0_i32, %c0_i32_0 : i32, i32, i32
  }
  func.func @transform_7(%arg0: i32) -> (i32, i32, i32) {
    %c0_i32 = arith.constant 0 : i32
    %c0_i32_0 = arith.constant 0 : i32
    %c0_i32_1 = arith.constant 0 : i32
    return %arg0, %c0_i32, %c0_i32_0 : i32, i32, i32
  }
}

</mosaic_0001>

<bundles_post_ra>
// kernel: tpu_custom_call.1
= control target key start
LH: loop header
LB: loop body
LE: loop exit
PB: predicated region body
PF: predicated region fallthrough
CT: control target
= control target key end

     0   :  { %13 = vsyncpa [#allocation3], 0  ;;  %s4558_s0 = inlined_call_operand.vmem [shape: f32[2,16,16,4], index: 0, kind: input, shape index: {}]   ;;  %s4559_s1 = inlined_call_operand.vmem [shape: f32[36,128], index: 1, kind: input, shape index: {}]   ;;  %s4560_s2 = inlined_call_operand.vmem [shape: f32[1,128], index: 2, kind: input, shape index: {}]   ;;  %s4561_s3 = inlined_call_operand.vmem [shape: f32[1,128], index: 3, kind: input, shape index: {}]   ;;  %s4562_s4 = inlined_call_operand.vmem [shape: f32[1,128], index: 4, kind: input, shape index: {}]   ;;  %s4563_s5 = inlined_call_operand.hbm [shape: f32[2,16,16,128], index: 5, kind: output, shape index: {0}]   ;;  %s4564_s6 = inlined_call_operand.hbm [shape: f32[2,1,128], index: 6, kind: output, shape index: {1}]   ;;  %s4565_s7 = inlined_call_operand.hbm [shape: f32[2,1,128], index: 7, kind: output, shape index: {2}]  }
   0x1   :  { %15 = vsyncpa [#allocation3 + $0x1], 0 }
   0x2   :  { %16 = vsyncpa [#allocation5], 0 }
   0x3   :  { %18 = vsyncpa [#allocation5 + $0x1], 0  ;;  %s2531_s24 = smov 0   ;;  %s2533_s25 = smov 0  }
   0x4   :  { %s2535_s3 = smov 0   ;;  %s2537_s4 = smov 0  }
   0x5 LB: > { %s2552_s26 = sadd.s32 4294967295, %s2480_s4   ;;  %s2237_s27 = sadd.s32 4294967294, %s2480_s4   ;;  %s2480_s4 = sphi %s2537_s4, %s5032_s4   ;;  %s2476_s3 = sphi %s2535_s3, %s5031_s3   ;;  %s2472_s25 = sphi %s2533_s25, %s5030_s25   ;;  %s2468_s24 = sphi %s2531_s24, %s5029_s24  }
   0x6   : > { %s2556_s28 = sadd.s32 1, %s2480_s4   ;;  %s141_s29 = sadd.s32 1, %s2476_s3 }
   0x7   : > { %s138_s30 = ssub.s32 %s2480_s4, %s2556_s28  ;;  %p151_p0 = scmp.ne.s32.totalorder %s2476_s3, %s2472_s25 }
   0x8   : > { %p139_p1 = scmp.eq.s32.totalorder %s138_s30, 0  ;;  %p152_p2 = scmp.eq.s32.totalorder %s2552_s26, 1 }
   0x9   : > { %p157_p3 = scmp.ne.s32.totalorder %s2472_s25, %s2468_s24  ;;  %p158_p4 = scmp.eq.s32.totalorder %s2237_s27, 1 }
   0xa   : > { %s2569_s8 = scalar_select %p139_p1, %s2476_s3, %s141_s29  }
   0xb   : > { %p2571_p5 = por %p152_p2, %p151_p0  ;;  %p2575_p6 = por %p158_p4, %p157_p3 }
   0xc   : > { %p2240_p7 = scmp.ge.s32.totalorder %s2480_s4, 1  ;;  %p248_p8 = scmp.lt.s32.totalorder %s2480_s4, 3 }
   0xe   : > { %p249_p9 = pnand %p2240_p7, %p248_p8 }
  0x10   : > { %252 = sbr.rel (%p249_p9) target bundleno = 982 (0x3d6), region = 40 }
  0x15   : > { %p288_p10 = scmp.lt.s32.totalorder %s2552_s26, 1  ;;  %vm357_vm0 = vcmask 1040384   ;;  %vm547_vm1 = vcmask 1046528   ;;  %s2482_s16 = smov 4   ;;  %vm713_vm2 = vcmask 1045504   ;;  %vm1449_vm3 = vcmask 31744  }
  0x16   : > { %s2483_s17 = smov 8   ;;  %s2484_s18 = smov 12   ;;  %vm1480_vm4 = vcmask 64512   ;;  %vm1511_vm5 = vcmask 97280   ;;  %vm1544_vm6 = vcmask 130048   ;;  %vm1577_vm7 = vcmask 162816  }
  0x17   : > { %s289_s11 = scalar_select %p288_p10, %s2552_s26, 1  ;;  %vm1815_vm8 = vcmask 1043456   ;;  %vm1610_vm9 = vcmask 195584   ;;  %vm1643_vm10 = vcmask 228352   ;;  %vm1676_vm11 = vcmask 261120  }
  0x18   : > { %s2485_s19 = smov 16   ;;  %s2486_s20 = smov 20   ;;  %vm1718_vm12 = vcmask 293888  }
  0x19   : > { %s2282_s12 = sshll.u32 %s289_s11, 8  ;;  %s2487_s21 = smov 24  }
  0x1a   : > { %s2586_s15 = scalar_lea.vmem %s4558_s0, %s2282_s12  ;;  %s2488_s22 = smov 32  }
  0x1b   : > { %v297_v0 = vld [vmem:[%s2586_s15 + $0x20] sm:$0xff]  ;;  %v298_v1 = vld [vmem:[%s2586_s15 + $0x28] sm:$0xff]  ;;  %v295_v2 = vld [vmem:[%s2586_s15 + $0x10] sm:$0xff]  ;;  %s2489_s23 = smov 28   ;;  %s4159_s29 = sand.u32 1, %s2472_s25  }
  0x1c   : > { %v364_v3 = vrot.slane %v297_v0, 7  ;;  %v365_v4 = vrot.slane %v298_v1, 7  ;;  %v296_v5 = vld [vmem:[%s2586_s15 + $0x18] sm:$0xff]  ;;  %v361_v6 = vrot.slane %v295_v2, 7  ;;  %v293_v7 = vld [vmem:[%s2586_s15] sm:$0xff]  ;;  %v294_v8 = vld [vmem:[%s2586_s15 + $0x8] sm:$0xff] }
  0x1d   : > { %v362_v9 = vrot.slane %v296_v5, 7  ;;  %v358_v10 = vrot.slane %v293_v7, 7  ;;  %v359_v11 = vrot.slane %v294_v8, 7  ;;  %v455_v12 = vrot.slane %v298_v1, 6  ;;  %v301_v25 = vld [vmem:[%s2586_s15 + $0x40] sm:$0xff]  ;;  %v302_v29 = vld [vmem:[%s2586_s15 + $0x48] sm:$0xff] }
  0x1e   : > { %v2595_v13 = vsel %vm357_vm0, %v364_v3, %v365_v4  ;;  %v2598_v14 = vsel %vm357_vm0, %v297_v0, %v364_v3  ;;  %v2601_v15 = vsel %vm357_vm0, %v295_v2, %v361_v6  ;;  %v454_v16 = vrot.slane %v296_v5, 6  ;;  %v299_v30 = vld [vmem:[%s2586_s15 + $0x30] sm:$0xff]  ;;  %v300_v31 = vld [vmem:[%s2586_s15 + $0x38] sm:$0xff]  ;;  %s2378_s11 = scalar_lea.hbm %s4563_s5, 512 }
  0x1f   : > { %4690 = vst [vmem:[#allocation9_spill] sm:$0xff] %v2598_v14  ;;  %v558_v17 = vrot.slane %v2598_v14, 1  ;;  %v559_v18 = vrot.slane %v2595_v13, 1  ;;  %v2606_v19 = vsel %vm357_vm0, %v361_v6, %v362_v9  ;;  %v553_v20 = vrot.slane %v2601_v15, 1  ;;  %v303_v52 = vld [vmem:[%s2586_s15 + $0x50] sm:$0xff]  ;;  %v304_v53 = vld [vmem:[%s2586_s15 + $0x58] sm:$0xff] }
  0x20   : > { %4691 = vst [vmem:[#allocation10_spill] sm:$0xff] %v2601_v15  ;;  %v554_v21 = vrot.slane %v2606_v19, 1  ;;  %v2611_v22 = vsel %vm357_vm0, %v358_v10, %v359_v11  ;;  %v2614_v23 = vsel %vm357_vm0, %v293_v7, %v358_v10  ;;  %v2617_v24 = vsel %vm357_vm0, %v365_v4, %v455_v12  ;;  %v307_v6 = vld [vmem:[%s2586_s15 + $0x70] sm:$0xff]  ;;  %v308_v7 = vld [vmem:[%s2586_s15 + $0x78] sm:$0xff]  ;;  %v306_v10 = vld [vmem:[%s2586_s15 + $0x68] sm:$0xff] }
  0x21   : > { %4692 = vst [vmem:[#allocation11_spill] sm:$0xff] %v2606_v19  ;;  %v2621_v26 = vsel %vm547_vm1, %v558_v17, %v559_v18  ;;  %v548_v27 = vrot.slane %v2614_v23, 1  ;;  %v549_v28 = vrot.slane %v2611_v22, 1  ;;  %v2634_v33 = vsel %vm357_vm0, %v362_v9, %v454_v16  ;;  %v305_v9 = vld [vmem:[%s2586_s15 + $0x60] sm:$0xff] }
  0x22   : > { %4693 = vst [vmem:[#allocation12_spill] sm:$0xff] %v2611_v22  ;;  %631 = vrot.lane.b32.xlu2 %v2621_v26, %s2482_s16  ;;  %v2631_v32 = vsel %vm547_vm1, %v553_v20, %v554_v21  ;;  %v453_v34 = vrot.slane %v294_v8, 6  ;;  %v561_v36 = vrot.slane %v2617_v24, 1  ;;  %v556_v37 = vrot.slane %v2634_v33, 1 }
  0x23   : > { %4694 = vst [vmem:[#allocation13_spill] sm:$0xff] %v2614_v23  ;;  %627 = vrot.lane.b32.xlu1 %v2631_v32, %s2482_s16  ;;  %v2639_v35 = vsel %vm547_vm1, %v548_v27, %v549_v28  ;;  %v370_v38 = vrot.slane %v301_v25, 7  ;;  %v371_v40 = vrot.slane %v302_v29, 7  ;;  %v367_v41 = vrot.slane %v299_v30, 7 }
  0x24   : > { %4695 = vst [vmem:[#allocation14_spill] sm:$0xff] %v2621_v26  ;;  %623 = vrot.lane.b32.xlu0 %v2639_v35, %s2482_s16  ;;  %v2646_v39 = vsel %vm357_vm0, %v359_v11, %v453_v34  ;;  %v368_v42 = vrot.slane %v300_v31, 7  ;;  %v456_v44 = vrot.slane %v300_v31, 6  ;;  %v2650_v45 = vsel %vm547_vm1, %v559_v18, %v561_v36  ;;  %v309_v34 = vld [vmem:[%s2586_s15 + $0x80] sm:$0xff] }
  0x25   : > { %v551_v43 = vrot.slane %v2646_v39, 1  ;;  %4696 = vst [vmem:[#allocation15_spill] sm:$0xff] %v2650_v45  ;;  %v2653_v46 = vsel %vm547_vm1, %v554_v21, %v556_v37  ;;  %v2656_v47 = vsel %vm357_vm0, %v370_v38, %v371_v40  ;;  %v2659_v48 = vsel %vm357_vm0, %v301_v25, %v370_v38 }
  0x26   : > { %v2662_v49 = vsel %vm357_vm0, %v367_v41, %v368_v42  ;;  %v2668_v51 = vsel %vm357_vm0, %v368_v42, %v456_v44  ;;  %v2675_v54 = vsel %vm357_vm0, %v299_v30, %v367_v41  ;;  %v568_v55 = vrot.slane %v2659_v48, 1 }
  0x27   : > { %v2665_v50 = vsel %vm547_vm1, %v549_v28, %v551_v43  ;;  %v569_v56 = vrot.slane %v2656_v47, 1  ;;  %v564_v57 = vrot.slane %v2662_v49, 1  ;;  %v566_v58 = vrot.slane %v2668_v51, 1 }
  0x28   : > { %v373_v59 = vrot.slane %v303_v52, 7  ;;  %v374_v60 = vrot.slane %v304_v53, 7  ;;  %v458_v61 = vrot.slane %v304_v53, 6  ;;  %v563_v62 = vrot.slane %v2675_v54, 1 }
  0x29   : > { %v457_v63 = vrot.slane %v302_v29, 6  ;;  %v2687_v0 = vsel %vm547_vm1, %v568_v55, %v569_v56  ;;  %v2690_v1 = vsel %vm547_vm1, %v564_v57, %v566_v58  ;;  %v379_v17 = vrot.slane %v307_v6, 7 }
  0x2a   : > { %633 = vrot.lane.b32.xlu2 %v2650_v45, %s2482_s16  ;;  %4697 = vst [vmem:[#allocation16_spill] sm:$0xff] %v2687_v0  ;;  %v2693_v2 = vsel %vm357_vm0, %v373_v59, %v374_v60  ;;  %v2696_v3 = vsel %vm357_vm0, %v374_v60, %v458_v61  ;;  %v2699_v4 = vsel %vm547_vm1, %v563_v62, %v564_v57  ;;  %v380_v18 = vrot.slane %v308_v7, 7 }
  0x2b   : > { %629 = vrot.lane.b32.xlu1 %v2653_v46, %s2482_s16  ;;  %4698 = vst [vmem:[#allocation17_spill] sm:$0xff] %v2690_v1  ;;  %v2702_v5 = vsel %vm357_vm0, %v303_v52, %v373_v59  ;;  %v2709_v8 = vsel %vm357_vm0, %v371_v40, %v457_v63  ;;  %v574_v11 = vrot.slane %v2693_v2, 1  ;;  %v576_v12 = vrot.slane %v2696_v3, 1  ;;  %v310_v40 = vld [vmem:[%s2586_s15 + $0x88] sm:$0xff] }
  0x2c   : > { %625 = vrot.lane.b32.xlu0 %v2665_v50, %s2482_s16  ;;  %v573_v16 = vrot.slane %v2702_v5, 1  ;;  %v571_v20 = vrot.slane %v2709_v8, 1  ;;  %v376_v21 = vrot.slane %v305_v9, 7  ;;  %v377_v25 = vrot.slane %v306_v10, 7 }
  0x2d   : > { %v459_v27 = vrot.slane %v306_v10, 6  ;;  %v2722_v28 = vsel %vm547_vm1, %v574_v11, %v576_v12  ;;  %v2728_v30 = vsel %vm357_vm0, %v379_v17, %v380_v18  ;;  %v2731_v31 = vsel %vm357_vm0, %v307_v6, %v379_v17  ;;  %v313_v6 = vld [vmem:[%s2586_s15 + $0xa0] sm:$0xff]  ;;  %v311_v10 = vld [vmem:[%s2586_s15 + $0x90] sm:$0xff] }
  0x2e   : > { %4699 = vst [vmem:[#allocation18_spill] sm:$0xff] %v2722_v28  ;;  %v2725_v29 = vsel %vm547_vm1, %v573_v16, %v574_v11  ;;  %v2735_v36 = vsel %vm547_vm1, %v569_v56, %v571_v20  ;;  %v2738_v37 = vsel %vm357_vm0, %v376_v21, %v377_v25  ;;  %v2747_v41 = vsel %vm357_vm0, %v305_v9, %v376_v21  ;;  %v312_v11 = vld [vmem:[%s2586_s15 + $0x98] sm:$0xff] }
  0x2f   : > { %4700 = vst [vmem:[#allocation19_spill] sm:$0xff] %v2725_v29  ;;  %v2741_v38 = vsel %vm357_vm0, %v377_v25, %v459_v27  ;;  %v583_v42 = vrot.slane %v2731_v31, 1  ;;  %v584_v43 = vrot.slane %v2728_v30, 1  ;;  %v382_v44 = vrot.slane %v309_v34, 7 }
  0x30   : > { %4701 = vst [vmem:[#allocation20_spill] sm:$0xff] %v2728_v30  ;;  %v579_v52 = vrot.slane %v2738_v37, 1  ;;  %v581_v53 = vrot.slane %v2741_v38, 1  ;;  %v383_v55 = vrot.slane %v310_v40, 7  ;;  %v461_v56 = vrot.slane %v310_v40, 6 }
  0x31   : > { %4702 = vst [vmem:[#allocation21_spill] sm:$0xff] %v2735_v36  ;;  %v578_v57 = vrot.slane %v2747_v41, 1  ;;  %v460_v58 = vrot.slane %v308_v7, 6  ;;  %v2759_v59 = vsel %vm547_vm1, %v583_v42, %v584_v43  ;;  %v2771_v63 = vsel %vm357_vm0, %v309_v34, %v382_v44  ;;  %v314_v7 = vld [vmem:[%s2586_s15 + $0xa8] sm:$0xff] }
  0x32   : > { %639 = vrot.lane.b32.xlu2 %v2687_v0, %s2482_s16  ;;  %4703 = vst [vmem:[#allocation22_spill] sm:$0xff] %v2738_v37  ;;  %v2762_v60 = vsel %vm547_vm1, %v579_v52, %v581_v53  ;;  %v2765_v61 = vsel %vm357_vm0, %v382_v44, %v383_v55  ;;  %v2768_v62 = vsel %vm357_vm0, %v383_v55, %v461_v56  ;;  %v588_v20 = vrot.slane %v2771_v63, 1 }
  0x33   : > { %637 = vrot.lane.b32.xlu1 %v2690_v1, %s2482_s16  ;;  %4704 = vst [vmem:[#allocation23_spill] sm:$0xff] %v2759_v59  ;;  %v2775_v9 = vsel %vm547_vm1, %v578_v57, %v579_v52  ;;  %v2783_v12 = vsel %vm357_vm0, %v380_v18, %v460_v58  ;;  %v589_v16 = vrot.slane %v2765_v61, 1  ;;  %v591_v17 = vrot.slane %v2768_v62, 1  ;;  %v315_v58 = vld [vmem:[%s2586_s15 + $0xb0] sm:$0xff] }
  0x34   : > { %635 = vrot.lane.b32.xlu0 %v2699_v4, %s2482_s16  ;;  %4705 = vst [vmem:[#allocation24_spill] sm:$0xff] %v2762_v60  ;;  %v388_v21 = vrot.slane %v313_v6, 7  ;;  %v389_v25 = vrot.slane %v314_v7, 7  ;;  %v385_v27 = vrot.slane %v311_v10, 7  ;;  %v386_v34 = vrot.slane %v312_v11, 7 }
  0x35   : > { %4706 = vst [vmem:[#allocation25_spill] sm:$0xff] %v2771_v63  ;;  %v586_v18 = vrot.slane %v2783_v12, 1  ;;  %v462_v40 = vrot.slane %v312_v11, 6  ;;  %v2794_v42 = vsel %vm547_vm1, %v589_v16, %v591_v17  ;;  %v2797_v44 = vsel %vm547_vm1, %v588_v20, %v589_v16  ;;  %v316_v11 = vld [vmem:[%s2586_s15 + $0xb8] sm:$0xff] }
  0x36   : > { %4707 = vst [vmem:[#allocation26_spill] sm:$0xff] %v2775_v9  ;;  %v2800_v52 = vsel %vm357_vm0, %v388_v21, %v389_v25  ;;  %v2803_v53 = vsel %vm357_vm0, %v313_v6, %v388_v21  ;;  %v2806_v55 = vsel %vm357_vm0, %v385_v27, %v386_v34  ;;  %v2819_v16 = vsel %vm357_vm0, %v311_v10, %v385_v27 }
  0x37   : > { %4708 = vst [vmem:[#allocation27_spill] sm:$0xff] %v2794_v42  ;;  %v2809_v56 = vsel %vm547_vm1, %v584_v43, %v586_v18  ;;  %v2812_v57 = vsel %vm357_vm0, %v386_v34, %v462_v40  ;;  %v598_v6 = vrot.slane %v2803_v53, 1  ;;  %v599_v43 = vrot.slane %v2800_v52, 1 }
  0x38   : > { %4709 = vst [vmem:[#allocation28_spill] sm:$0xff] %v2797_v44  ;;  %v594_v17 = vrot.slane %v2806_v55, 1  ;;  %v596_v20 = vrot.slane %v2812_v57, 1  ;;  %v391_v10 = vrot.slane %v315_v58, 7  ;;  %v392_v21 = vrot.slane %v316_v11, 7 }
  0x39   : > { %4710 = vst [vmem:[#allocation29_spill] sm:$0xff] %v2800_v52  ;;  %v464_v27 = vrot.slane %v316_v11, 6  ;;  %v593_v34 = vrot.slane %v2819_v16, 1  ;;  %v463_v18 = vrot.slane %v314_v7, 6  ;;  %v2831_v40 = vsel %vm547_vm1, %v598_v6, %v599_v43  ;;  %v320_v7 = vld [vmem:[%s2586_s15 + $0xd8] sm:$0xff]  ;;  %v318_v6 = vld [vmem:[%s2586_s15 + $0xc8] sm:$0xff] }
  0x3a   : > { %645 = vrot.lane.b32.xlu2 %v2722_v28, %s2482_s16  ;;  %4711 = vst [vmem:[#allocation30_spill] sm:$0xff] %v2809_v56 }
  0x3b   : > { %643 = vrot.lane.b32.xlu1 %v2725_v29, %s2482_s16  ;;  %4712 = vst [vmem:[#allocation31_spill] sm:$0xff] %v2831_v40  ;;  %v2847_v11 = vsel %vm547_vm1, %v593_v34, %v594_v17  ;;  %v317_v29 = vld [vmem:[%s2586_s15 + $0xc0] sm:$0xff] }
  0x3c   : > { %641 = vrot.lane.b32.xlu0 %v2735_v36, %s2482_s16  ;;  %4716 = vst [vmem:[#allocation35_spill] sm:$0xff] %v2847_v11  ;;  %v394_v34 = vrot.slane %v317_v29, 7  ;;  %v322_v36 = vld [vmem:[%s2586_s15 + $0xe8] sm:$0xff] }
  0x42   : > { %651 = vrot.lane.b32.xlu2 %v2759_v59, %s2482_s16  ;;  %v2843_v59 = vsel %vm357_vm0, %v315_v58, %v391_v10 }
  0x43   : > { %649 = vrot.lane.b32.xlu1 %v2762_v60, %s2482_s16  ;;  %v2840_v60 = vsel %vm357_vm0, %v392_v21, %v464_v27  ;;  %4715 = vst [vmem:[#allocation34_spill] sm:$0xff] %v2843_v59  ;;  %v398_v27 = vrot.slane %v320_v7, 7 }
  0x44   : > { %647 = vrot.lane.b32.xlu0 %v2775_v9, %s2482_s16  ;;  %v606_v58 = vrot.slane %v2840_v60, 1 }
  0x4a   : > { %657 = vrot.lane.b32.xlu2 %v2794_v42, %s2482_s16  ;;  %v2837_v42 = vsel %vm357_vm0, %v391_v10, %v392_v21 }
  0x4b   : > { %655 = vrot.lane.b32.xlu1 %v2797_v44, %s2482_s16  ;;  %v2834_v44 = vsel %vm547_vm1, %v594_v17, %v596_v20  ;;  %4714 = vst [vmem:[#allocation33_spill] sm:$0xff] %v2837_v42  ;;  %v2855_v20 = vsel %vm357_vm0, %v389_v25, %v463_v18  ;;  %v604_v21 = vrot.slane %v2837_v42, 1  ;;  %v603_v17 = vrot.slane %v2843_v59, 1 }
  0x4c   : > { %653 = vrot.lane.b32.xlu0 %v2809_v56, %s2482_s16  ;;  %4713 = vst [vmem:[#allocation32_spill] sm:$0xff] %v2834_v44  ;;  %v319_v56 = vld [vmem:[%s2586_s15 + $0xd0] sm:$0xff]  ;;  %v601_v25 = vrot.slane %v2855_v20, 1  ;;  %v465_v18 = vrot.slane %v318_v6, 6 }
  0x4d   : > { %v397_v10 = vrot.slane %v319_v56, 7  ;;  %v2869_v28 = vsel %vm547_vm1, %v603_v17, %v604_v21 }
  0x4e   : > { %4718 = vst [vmem:[#allocation37_spill] sm:$0xff] %v2869_v28  ;;  %v2881_v0 = vsel %vm547_vm1, %v599_v43, %v601_v25  ;;  %v401_v25 = vrot.slane %v322_v36, 7 }
  0x4f   : > { %v2872_v9 = vsel %vm357_vm0, %v397_v10, %v398_v27  ;;  %v2875_v1 = vsel %vm357_vm0, %v319_v56, %v397_v10  ;;  %4722 = vst [vmem:[#allocation41_spill] sm:$0xff] %v2881_v0 }
  0x50   : > { %4719 = vst [vmem:[#allocation38_spill] sm:$0xff] %v2872_v9  ;;  %v613_v56 = vrot.slane %v2875_v1, 1  ;;  %v614_v17 = vrot.slane %v2872_v9, 1 }
  0x51   : > { %4720 = vst [vmem:[#allocation39_spill] sm:$0xff] %v2875_v1 }
  0x52   : > { %663 = vrot.lane.b32.xlu2 %v2831_v40, %s2482_s16  ;;  %v395_v40 = vrot.slane %v318_v6, 7 }
  0x53   : > { %661 = vrot.lane.b32.xlu1 %v2834_v44, %s2482_s16  ;;  %v2866_v44 = vsel %vm547_vm1, %v604_v21, %v606_v58  ;;  %v321_v58 = vld [vmem:[%s2586_s15 + $0xe0] sm:$0xff]  ;;  %v2891_v21 = vsel %vm357_vm0, %v317_v29, %v394_v34 }
  0x54   : > { %659 = vrot.lane.b32.xlu0 %v2847_v11, %s2482_s16  ;;  %4717 = vst [vmem:[#allocation36_spill] sm:$0xff] %v2866_v44  ;;  %v2878_v11 = vsel %vm357_vm0, %v394_v34, %v395_v40  ;;  %v2884_v6 = vsel %vm357_vm0, %v395_v40, %v465_v18  ;;  %v400_v10 = vrot.slane %v321_v58, 7  ;;  %v467_v18 = vrot.slane %v322_v36, 6 }
  0x55   : > { %4721 = vst [vmem:[#allocation40_spill] sm:$0xff] %v2878_v11  ;;  %v609_v43 = vrot.slane %v2878_v11, 1  ;;  %v611_v40 = vrot.slane %v2884_v6, 1  ;;  %v608_v29 = vrot.slane %v2891_v21, 1  ;;  %v466_v34 = vrot.slane %v320_v7, 6 }
  0x56   : > { %4723 = vst [vmem:[#allocation42_spill] sm:$0xff] %v2891_v21  ;;  %v2909_v26 = vsel %vm357_vm0, %v400_v10, %v401_v25  ;;  %v2912_v45 = vsel %vm357_vm0, %v401_v25, %v467_v18  ;;  %v2918_v36 = vsel %vm357_vm0, %v321_v58, %v400_v10  ;;  %v719_v18 = vrot.slane %v2601_v15, 2 }
  0x57   : > { %4726 = vst [vmem:[#allocation45_spill] sm:$0xff] %v2909_v26  ;;  %v2923_v7 = vsel %vm357_vm0, %v398_v27, %v466_v34  ;;  %v715_v34 = vrot.slane %v2611_v22, 2 }
  0x58   : > { %4728 = vst [vmem:[#allocation47_spill] sm:$0xff] %v2918_v36  ;;  %v616_v58 = vrot.slane %v2923_v7, 1 }
  0x5a   : > { %669 = vrot.lane.b32.xlu2 %v2866_v44, %s2482_s16  ;;  %v2903_v44 = vsel %vm547_vm1, %v613_v56, %v614_v17  ;;  %v619_v56 = vrot.slane %v2909_v26, 1  ;;  %v2940_v25 = vsel %vm547_vm1, %v614_v17, %v616_v58  ;;  %v714_v17 = vrot.slane %v2614_v23, 2 }
  0x5b   : > { %667 = vrot.lane.b32.xlu1 %v2869_v28, %s2482_s16  ;;  %4724 = vst [vmem:[#allocation43_spill] sm:$0xff] %v2903_v44  ;;  %v2906_v28 = vsel %vm547_vm1, %v609_v43, %v611_v40  ;;  %v621_v40 = vrot.slane %v2912_v45, 1 }
  0x5c   : > { %665 = vrot.lane.b32.xlu0 %v2881_v0, %s2482_s16  ;;  %4725 = vst [vmem:[#allocation44_spill] sm:$0xff] %v2906_v28  ;;  %v2915_v0 = vsel %vm547_vm1, %v608_v29, %v609_v43  ;;  %v618_v43 = vrot.slane %v2918_v36, 1  ;;  %v720_v29 = vrot.slane %v2606_v19, 2  ;;  %v2960_v58 = vsel %vm713_vm2, %v714_v17, %v715_v34 }
  0x5d   : > { %4727 = vst [vmem:[#allocation46_spill] sm:$0xff] %v2915_v0  ;;  %v2934_v10 = vsel %vm547_vm1, %v619_v56, %v621_v40 }
  0x5e   : > { %4729 = vst [vmem:[#allocation48_spill] sm:$0xff] %v2934_v10  ;;  %v2937_v27 = vsel %vm547_vm1, %v618_v43, %v619_v56  ;;  %v717_v56 = vrot.slane %v2646_v39, 2  ;;  %v2954_v40 = vsel %vm713_vm2, %v719_v18, %v720_v29  ;;  %v725_v39 = vrot.slane %v2595_v13, 2 }
  0x5f   : > { %4730 = vst [vmem:[#allocation49_spill] sm:$0xff] %v2937_v27  ;;  %v724_v18 = vrot.slane %v2598_v14, 2 }
  0x60   : > { %4731 = vst [vmem:[#allocation50_spill] sm:$0xff] %v2940_v25  ;;  %v2957_v43 = vsel %vm713_vm2, %v715_v34, %v717_v56  ;;  %v722_v56 = vrot.slane %v2634_v33, 2 }
  0x61   : > { %4732 = vst [vmem:[#allocation51_spill] sm:$0xff] %v2954_v40  ;;  %v2976_v17 = vsel %vm713_vm2, %v724_v18, %v725_v39 }
  0x62   : > { %675 = vrot.lane.b32.xlu2 %v2903_v44, %s2482_s16  ;;  %4733 = vst [vmem:[#allocation52_spill] sm:$0xff] %v2960_v58 }
  0x63   : > { %673 = vrot.lane.b32.xlu1 %v2906_v28, %s2482_s16 }
  0x64   : > { %671 = vrot.lane.b32.xlu0 %v2915_v0, %s2482_s16 }
  0x6a   : > { %681 = vrot.lane.b32.xlu2 %v2934_v10, %s2482_s16 }
  0x6b   : > { %679 = vrot.lane.b32.xlu1 %v2937_v27, %s2482_s16  ;;  %v727_v27 = vrot.slane %v2617_v24, 2  ;;  %v734_v24 = vrot.slane %v2659_v48, 2 }
  0x6c   : > { %677 = vrot.lane.b32.xlu0 %v2940_v25, %s2482_s16  ;;  %s2073_s16 = scalar_lea.sflag [#allocation3], %s4159_s29 }
  0x6d   : > { %v2973_v34 = vsel %vm713_vm2, %v725_v39, %v727_v27  ;;  %v730_v27 = vrot.slane %v2662_v49, 2  ;;  %v729_v39 = vrot.slane %v2675_v54, 2 }
  0x6e   : > { %4734 = vst [vmem:[#allocation53_spill] sm:$0xff] %v2973_v34 }
  0x72   : > { %793 = vrot.lane.b32.xlu2 %v2954_v40, %s2483_s17  ;;  %v2979_v40 = vsel %vm713_vm2, %v720_v29, %v722_v56  ;;  %v732_v29 = vrot.slane %v2668_v51, 2  ;;  %v742_v51 = vrot.slane %v2696_v3, 2  ;;  %v749_v3 = vrot.slane %v2731_v31, 2 }
  0x73   : > { %791 = vrot.lane.b32.xlu1 %v2957_v43, %s2483_s17 }
  0x74   : > { %789 = vrot.lane.b32.xlu0 %v2960_v58, %s2483_s17  ;;  %v735_v58 = vrot.slane %v2656_v47, 2  ;;  %v2998_v56 = vsel %vm713_vm2, %v730_v27, %v732_v29  ;;  %v739_v29 = vrot.slane %v2702_v5, 2 }
  0x75   : > { %4737 = vst [vmem:[#allocation56_spill] sm:$0xff] %v2998_v56 }
  0x76   : > { %v2995_v18 = vsel %vm713_vm2, %v734_v24, %v735_v58 }
  0x77   : > { %4736 = vst [vmem:[#allocation55_spill] sm:$0xff] %v2995_v18 }
  0x7a   : > { %799 = vrot.lane.b32.xlu2 %v2973_v34, %s2483_s17  ;;  %v3001_v34 = vsel %vm713_vm2, %v729_v39, %v730_v27  ;;  %v737_v27 = vrot.slane %v2709_v8, 2 }
  0x7b   : > { %797 = vrot.lane.b32.xlu1 %v2976_v17, %s2483_s17 }
  0x7c   : > { %795 = vrot.lane.b32.xlu0 %v2979_v40, %s2483_s17  ;;  %v2989_v33 = vpop.permute.xlu2 %631 }
  0x7d   : > { %4735 = vst [vmem:[#allocation54_spill] sm:$0xff] %v2989_v33  ;;  %v740_v33 = vrot.slane %v2693_v2, 2 }
  0x7f   : > { %v3016_v39 = vsel %vm713_vm2, %v740_v33, %v742_v51  ;;  %v744_v51 = vrot.slane %v2747_v41, 2 }
  0x80   : > { %4739 = vst [vmem:[#allocation58_spill] sm:$0xff] %v3016_v39 }
  0x82   : > { %805 = vrot.lane.b32.xlu2 %v2995_v18, %s2483_s17  ;;  %v3019_v18 = vsel %vm713_vm2, %v739_v29, %v740_v33  ;;  %v745_v33 = vrot.slane %v2738_v37, 2 }
  0x83   : > { %803 = vrot.lane.b32.xlu1 %v2998_v56, %s2483_s17  ;;  %v3022_v56 = vsel %vm713_vm2, %v735_v58, %v737_v27  ;;  %v747_v58 = vrot.slane %v2741_v38, 2  ;;  %v757_v38 = vrot.slane %v2768_v62, 2 }
  0x84   : > { %801 = vrot.lane.b32.xlu0 %v3001_v34, %s2483_s17  ;;  %v3011_v24 = vpop.permute.xlu2 %633  ;;  %4740 = vst [vmem:[#allocation59_spill] sm:$0xff] %v3022_v56 }
  0x85   : > { %4738 = vst [vmem:[#allocation57_spill] sm:$0xff] %v3011_v24  ;;  %v750_v24 = vrot.slane %v2728_v30, 2  ;;  %v3041_v27 = vsel %vm713_vm2, %v745_v33, %v747_v58  ;;  %v754_v58 = vrot.slane %v2771_v63, 2 }
  0x86   : > { %4743 = vst [vmem:[#allocation62_spill] sm:$0xff] %v3041_v27 }
  0x87   : > { %v3038_v29 = vsel %vm713_vm2, %v749_v3, %v750_v24 }
  0x88   : > { %4742 = vst [vmem:[#allocation61_spill] sm:$0xff] %v3038_v29 }
  0x8a   : > { %811 = vrot.lane.b32.xlu2 %v3016_v39, %s2483_s17  ;;  %v3044_v39 = vsel %vm713_vm2, %v744_v51, %v745_v33  ;;  %v752_v33 = vrot.slane %v2783_v12, 2  ;;  %v765_v12 = vrot.slane %v2800_v52, 2 }
  0x8b   : > { %809 = vrot.lane.b32.xlu1 %v3019_v18, %s2483_s17 }
  0x8c   : > { %807 = vrot.lane.b32.xlu0 %v3022_v56, %s2483_s17  ;;  %v3032_v8 = vpop.permute.xlu2 %639  ;;  %v3069_v62 = vsel %vm713_vm2, %v750_v24, %v752_v33  ;;  %v762_v24 = vrot.slane %v2812_v57, 2  ;;  %v759_v33 = vrot.slane %v2819_v16, 2  ;;  %v770_v57 = vrot.slane %v2837_v42, 2 }
  0x8d   : > { %4741 = vst [vmem:[#allocation60_spill] sm:$0xff] %v3032_v8  ;;  %v755_v8 = vrot.slane %v2765_v61, 2 }
  0x8e   : > { %4749 = vst [vmem:[#allocation68_spill] sm:$0xff] %v3069_v62 }
  0x92   : > { %817 = vrot.lane.b32.xlu2 %v3038_v29, %s2483_s17  ;;  %v3063_v29 = vsel %vm713_vm2, %v755_v8, %v757_v38 }
  0x93   : > { %815 = vrot.lane.b32.xlu1 %v3041_v27, %s2483_s17  ;;  %4747 = vst [vmem:[#allocation66_spill] sm:$0xff] %v3063_v29  ;;  %v3066_v27 = vsel %vm713_vm2, %v754_v58, %v755_v8  ;;  %v760_v8 = vrot.slane %v2806_v55, 2 }
  0x94   : > { %813 = vrot.lane.b32.xlu0 %v3044_v39, %s2483_s17  ;;  %v3054_v3 = vpop.permute.xlu2 %645  ;;  %4748 = vst [vmem:[#allocation67_spill] sm:$0xff] %v3066_v27 }
  0x95   : > { %4744 = vst [vmem:[#allocation63_spill] sm:$0xff] %v3054_v3  ;;  %v3057_v56 = vpop.permute.xlu1 %627 }
  0x96   : > { %4745 = vst [vmem:[#allocation64_spill] sm:$0xff] %v3057_v56  ;;  %v3060_v51 = vpop.permute.xlu0 %623  ;;  %v764_v56 = vrot.slane %v2803_v53, 2 }
  0x97   : > { %4746 = vst [vmem:[#allocation65_spill] sm:$0xff] %v3060_v51 }
  0x98   : > { %v3089_v3 = vsel %vm713_vm2, %v764_v56, %v765_v12 }
  0x99   : > { %4753 = vst [vmem:[#allocation72_spill] sm:$0xff] %v3089_v3 }
  0x9a   : > { %823 = vrot.lane.b32.xlu2 %v3063_v29, %s2483_s17  ;;  %v3092_v29 = vsel %vm713_vm2, %v760_v8, %v762_v24  ;;  %v769_v24 = vrot.slane %v2843_v59, 2 }
  0x9b   : > { %821 = vrot.lane.b32.xlu1 %v3066_v27, %s2483_s17 }
  0x9c   : > { %819 = vrot.lane.b32.xlu0 %v3069_v62, %s2483_s17  ;;  %v3079_v38 = vpop.permute.xlu2 %651  ;;  %v3095_v62 = vsel %vm713_vm2, %v759_v33, %v760_v8  ;;  %v767_v8 = vrot.slane %v2855_v20, 2  ;;  %v780_v20 = vrot.slane %v2872_v9, 2 }
  0x9d   : > { %4750 = vst [vmem:[#allocation69_spill] sm:$0xff] %v3079_v38  ;;  %v3083_v58 = vpop.permute.xlu1 %629 }
  0x9e   : > { %4751 = vst [vmem:[#allocation70_spill] sm:$0xff] %v3083_v58  ;;  %v3086_v51 = vpop.permute.xlu0 %625  ;;  %v772_v58 = vrot.slane %v2840_v60, 2  ;;  %v3120_v60 = vsel %vm713_vm2, %v765_v12, %v767_v8  ;;  %v777_v12 = vrot.slane %v2884_v6, 2  ;;  %v774_v8 = vrot.slane %v2891_v21, 2 }
  0x9f   : > { %4752 = vst [vmem:[#allocation71_spill] sm:$0xff] %v3086_v51  ;;  %v785_v6 = vrot.slane %v2909_v26, 2 }
  0xa0   : > { %v3114_v38 = vsel %vm713_vm2, %v770_v57, %v772_v58  ;;  %4759 = vst [vmem:[#allocation78_spill] sm:$0xff] %v3120_v60 }
  0xa1   : > { %4757 = vst [vmem:[#allocation76_spill] sm:$0xff] %v3114_v38 }
  0xa2   : > { %829 = vrot.lane.b32.xlu2 %v3089_v3, %s2483_s17  ;;  %v3117_v3 = vsel %vm713_vm2, %v769_v24, %v770_v57  ;;  %v775_v57 = vrot.slane %v2878_v11, 2 }
  0xa3   : > { %827 = vrot.lane.b32.xlu1 %v3092_v29, %s2483_s17  ;;  %4758 = vst [vmem:[#allocation77_spill] sm:$0xff] %v3117_v3 }
  0xa4   : > { %825 = vrot.lane.b32.xlu0 %v3095_v62, %s2483_s17  ;;  %v3105_v56 = vpop.permute.xlu2 %657 }
  0xa5   : > { %4754 = vst [vmem:[#allocation73_spill] sm:$0xff] %v3105_v56  ;;  %v3108_v51 = vpop.permute.xlu1 %637 }
  0xa6   : > { %4755 = vst [vmem:[#allocation74_spill] sm:$0xff] %v3108_v51  ;;  %v3111_v33 = vpop.permute.xlu0 %635  ;;  %v779_v51 = vrot.slane %v2875_v1, 2 }
  0xa7   : > { %4756 = vst [vmem:[#allocation75_spill] sm:$0xff] %v3111_v33 }
  0xa8   : > { %v3140_v56 = vsel %vm713_vm2, %v779_v51, %v780_v20 }
  0xa9   : > { %4762 = vst [vmem:[#allocation81_spill] sm:$0xff] %v3140_v56 }
  0xaa   : > { %835 = vrot.lane.b32.xlu2 %v3114_v38, %s2483_s17  ;;  %v3143_v38 = vsel %vm713_vm2, %v775_v57, %v777_v12  ;;  %v784_v12 = vrot.slane %v2918_v36, 2 }
  0xab   : > { %833 = vrot.lane.b32.xlu1 %v3117_v3, %s2483_s17  ;;  %4763 = vst [vmem:[#allocation82_spill] sm:$0xff] %v3143_v38 }
  0xac   : > { %831 = vrot.lane.b32.xlu0 %v3120_v60, %s2483_s17  ;;  %v3130_v58 = vpop.permute.xlu2 %663  ;;  %v3146_v60 = vsel %vm713_vm2, %v774_v8, %v775_v57  ;;  %v782_v57 = vrot.slane %v2923_v7, 2 }
  0xad   : > { %v3134_v24 = vpop.permute.xlu1 %643  ;;  %4764 = vst [vmem:[#allocation83_spill] sm:$0xff] %v3146_v60 }
  0xae   : > { %4760 = vst [vmem:[#allocation79_spill] sm:$0xff] %v3134_v24  ;;  %v3137_v33 = vpop.permute.xlu0 %641  ;;  %v787_v24 = vrot.slane %v2912_v45, 2  ;;  %v3171_v45 = vsel %vm713_vm2, %v780_v20, %v782_v57 }
  0xaf   : > { %4761 = vst [vmem:[#allocation80_spill] sm:$0xff] %v3137_v33 }
  0xb0   : > { %4770 = vst [vmem:[#allocation89_spill] sm:$0xff] %v3171_v45 }
  0xb2   : > { %841 = vrot.lane.b32.xlu2 %v3140_v56, %s2483_s17  ;;  %v3165_v56 = vsel %vm713_vm2, %v785_v6, %v787_v24 }
  0xb3   : > { %839 = vrot.lane.b32.xlu1 %v3143_v38, %s2483_s17  ;;  %4768 = vst [vmem:[#allocation87_spill] sm:$0xff] %v3165_v56  ;;  %v3168_v38 = vsel %vm713_vm2, %v784_v12, %v785_v6 }
  0xb4   : > { %837 = vrot.lane.b32.xlu0 %v3146_v60, %s2483_s17  ;;  %v3156_v51 = vpop.permute.xlu2 %669  ;;  %4769 = vst [vmem:[#allocation88_spill] sm:$0xff] %v3168_v38 }
  0xb5   : > { %4765 = vst [vmem:[#allocation84_spill] sm:$0xff] %v3156_v51  ;;  %v3159_v33 = vpop.permute.xlu1 %649 }
  0xb6   : > { %4766 = vst [vmem:[#allocation85_spill] sm:$0xff] %v3159_v33  ;;  %v3162_v8 = vpop.permute.xlu0 %647 }
  0xb7   : > { %4767 = vst [vmem:[#allocation86_spill] sm:$0xff] %v3162_v8 }
  0xba   : > { %847 = vrot.lane.b32.xlu2 %v3165_v56, %s2483_s17 }
  0xbb   : > { %845 = vrot.lane.b32.xlu1 %v3168_v38, %s2483_s17 }
  0xbc   : > { %843 = vrot.lane.b32.xlu0 %v3171_v45, %s2483_s17  ;;  %v3179_v7 = vpop.permute.xlu2 %675 }
  0xbd   : > { %4771 = vst [vmem:[#allocation90_spill] sm:$0xff] %v3179_v7  ;;  %v3181_v51 = vpop.permute.xlu1 %655 }
  0xbe   : > { %4772 = vst [vmem:[#allocation91_spill] sm:$0xff] %v3181_v51  ;;  %v3183_v24 = vpop.permute.xlu0 %653 }
  0xbf   : > { %4773 = vst [vmem:[#allocation92_spill] sm:$0xff] %v3183_v24  ;;  %v3295_v24 = vld [vmem:[%s2586_s15 + $0xf8] sm:$0xff] }
  0xc2   : > { %884 = vrot.lane.b32.xlu2 %v2601_v15, %s2484_s18 }
  0xc3   : > { %882 = vrot.lane.b32.xlu1 %v2611_v22, %s2484_s18 }
  0xc4   : > { %880 = vrot.lane.b32.xlu0 %v2614_v23, %s2484_s18  ;;  %v3191_v20 = vpop.permute.xlu2 %681 }
  0xc5   : > { %4774 = vst [vmem:[#allocation93_spill] sm:$0xff] %v3191_v20  ;;  %v3193_v6 = vpop.permute.xlu1 %661 }
  0xc6   : > { %4775 = vst [vmem:[#allocation94_spill] sm:$0xff] %v3193_v6  ;;  %v3195_v12 = vpop.permute.xlu0 %659 }
  0xc7   : > { %4776 = vst [vmem:[#allocation95_spill] sm:$0xff] %v3195_v12 }
  0xca   : > { %890 = vrot.lane.b32.xlu2 %v2595_v13, %s2484_s18 }
  0xcb   : > { %888 = vrot.lane.b32.xlu1 %v2598_v14, %s2484_s18 }
  0xcc   : > { %886 = vrot.lane.b32.xlu0 %v2606_v19, %s2484_s18  ;;  %v3203_v57 = vpop.permute.xlu2 %793 }
  0xcd   : > { %4777 = vst [vmem:[#allocation96_spill] sm:$0xff] %v3203_v57  ;;  %v3205_v7 = vpop.permute.xlu1 %667 }
  0xce   : > { %4778 = vst [vmem:[#allocation97_spill] sm:$0xff] %v3205_v7  ;;  %v3207_v56 = vpop.permute.xlu0 %665 }
  0xcf   : > { %4779 = vst [vmem:[#allocation98_spill] sm:$0xff] %v3207_v56 }
  0xd2   : > { %896 = vrot.lane.b32.xlu2 %v2659_v48, %s2484_s18 }
  0xd3   : > { %894 = vrot.lane.b32.xlu1 %v2662_v49, %s2484_s18 }
  0xd4   : > { %892 = vrot.lane.b32.xlu0 %v2675_v54, %s2484_s18  ;;  %v3215_v20 = vpop.permute.xlu2 %799 }
  0xd5   : > { %v3217_v38 = vpop.permute.xlu1 %673 }
  0xd6   : > { %4780 = vst [vmem:[#allocation99_spill] sm:$0xff] %v3217_v38  ;;  %v3219_v45 = vpop.permute.xlu0 %671 }
  0xd7   : > { %4781 = vst [vmem:[#allocation100_spill] sm:$0xff] %v3219_v45 }
  0xda   : > { %902 = vrot.lane.b32.xlu2 %v2693_v2, %s2484_s18 }
  0xdb   : > { %900 = vrot.lane.b32.xlu1 %v2702_v5, %s2484_s18 }
  0xdc   : > { %898 = vrot.lane.b32.xlu0 %v2656_v47, %s2484_s18  ;;  %v3227_v57 = vpop.permute.xlu2 %805 }
  0xdd   : > { %v3229_v22 = vpop.permute.xlu1 %679 }
  0xde   : > { %4782 = vst [vmem:[#allocation101_spill] sm:$0xff] %v3229_v22  ;;  %v3231_v23 = vpop.permute.xlu0 %677 }
  0xdf   : > { %4783 = vst [vmem:[#allocation102_spill] sm:$0xff] %v3231_v23 }
  0xe2   : > { %908 = vrot.lane.b32.xlu2 %v2731_v31, %s2484_s18 }
  0xe3   : > { %906 = vrot.lane.b32.xlu1 %v2738_v37, %s2484_s18 }
  0xe4   : > { %904 = vrot.lane.b32.xlu0 %v2747_v41, %s2484_s18  ;;  %v3239_v38 = vpop.permute.xlu2 %811 }
  0xe5   : > { %v3241_v45 = vpop.permute.xlu1 %791 }
  0xe6   : > { %4784 = vst [vmem:[#allocation103_spill] sm:$0xff] %v3241_v45  ;;  %v3243_v56 = vpop.permute.xlu0 %789 }
  0xe7   : > { %4785 = vst [vmem:[#allocation104_spill] sm:$0xff] %v3243_v56 }
  0xea   : > { %914 = vrot.lane.b32.xlu2 %v2765_v61, %s2484_s18 }
  0xeb   : > { %912 = vrot.lane.b32.xlu1 %v2771_v63, %s2484_s18 }
  0xec   : > { %910 = vrot.lane.b32.xlu0 %v2728_v30, %s2484_s18  ;;  %v3251_v22 = vpop.permute.xlu2 %817  ;;  %v323_v30 = vld [vmem:[%s2586_s15 + $0xf0] sm:$0xff] }
  0xed   : > { %v3253_v23 = vpop.permute.xlu1 %797 }
  0xee   : > { %4786 = vst [vmem:[#allocation105_spill] sm:$0xff] %v3253_v23  ;;  %v3255_v7 = vpop.permute.xlu0 %795 }
  0xef   : > { %4787 = vst [vmem:[#allocation106_spill] sm:$0xff] %v3255_v7 }
  0xf2   : > { %920 = vrot.lane.b32.xlu2 %v2803_v53, %s2484_s18 }
  0xf3   : > { %918 = vrot.lane.b32.xlu1 %v2806_v55, %s2484_s18 }
  0xf4   : > { %916 = vrot.lane.b32.xlu0 %v2819_v16, %s2484_s18  ;;  %v3263_v45 = vpop.permute.xlu2 %823 }
  0xf5   : > { %v3265_v56 = vpop.permute.xlu1 %803 }
  0xf6   : > { %v3267_v12 = vpop.permute.xlu0 %801 }
  0xfa   : > { %926 = vrot.lane.b32.xlu2 %v2837_v42, %s2484_s18 }
  0xfb   : > { %924 = vrot.lane.b32.xlu1 %v2843_v59, %s2484_s18 }
  0xfc   : > { %922 = vrot.lane.b32.xlu0 %v2800_v52, %s2484_s18  ;;  %v3275_v23 = vpop.permute.xlu2 %829 }
  0xfd   : > { %v3277_v7 = vpop.permute.xlu1 %809 }
  0xfe   : > { %v3279_v6 = vpop.permute.xlu0 %807 }
  0xff   : > { %4788 = vst [vmem:[#allocation107_spill] sm:$0xff] %v3279_v6 }
 0x102   : > { %932 = vrot.lane.b32.xlu2 %v2875_v1, %s2484_s18 }
 0x103   : > { %930 = vrot.lane.b32.xlu1 %v2878_v11, %s2484_s18 }
 0x104   : > { %928 = vrot.lane.b32.xlu0 %v2891_v21, %s2484_s18  ;;  %v3287_v42 = vpop.permute.xlu2 %835  ;;  %v403_v21 = vrot.slane %v323_v30, 7 }
 0x105   : > { %4789 = vst [vmem:[#allocation108_spill] sm:$0xff] %v3287_v42  ;;  %v3289_v59 = vpop.permute.xlu1 %815  ;;  %v4667_v42 = vrot.slane %v3295_v24, 7 }
 0x106   : > { %4790 = vst [vmem:[#allocation109_spill] sm:$0xff] %v3289_v59  ;;  %v3291_v52 = vpop.permute.xlu0 %813  ;;  %v4819_v59 = vld [vmem:[#allocation30_spill] sm:$0xff] }
 0x107   : > { %4791 = vst [vmem:[#allocation110_spill] sm:$0xff] %v3291_v52  ;;  %v3313_v51 = vsel %vm357_vm0, %v403_v21, %v4667_v42  ;;  %v4803_v42 = vld [vmem:[#allocation15_spill] sm:$0xff] }
 0x108   : > { %4795 = vst [vmem:[#allocation114_spill] sm:$0xff] %v3313_v51 }
 0x10a   : > { %938 = vrot.lane.b32.xlu2 %v2909_v26, %s2484_s18  ;;  %v3316_v26 = vsel %vm357_vm0, %v323_v30, %v403_v21 }
 0x10b   : > { %936 = vrot.lane.b32.xlu1 %v2918_v36, %s2484_s18  ;;  %4796 = vst [vmem:[#allocation115_spill] sm:$0xff] %v3316_v26 }
 0x10c   : > { %934 = vrot.lane.b32.xlu0 %v2872_v9, %s2484_s18  ;;  %v3303_v11 = vpop.permute.xlu2 %841 }
 0x10d   : > { %4792 = vst [vmem:[#allocation111_spill] sm:$0xff] %v3303_v11  ;;  %v3306_v1 = vpop.permute.xlu1 %821 }
 0x10e   : > { %4793 = vst [vmem:[#allocation112_spill] sm:$0xff] %v3306_v1  ;;  %v3308_v63 = vpop.permute.xlu0 %819 }
 0x10f   : > { %4794 = vst [vmem:[#allocation113_spill] sm:$0xff] %v3308_v63 }
 0x112   : > { %982 = vrot.lane.b32.xlu2 %v2639_v35, %s2485_s19 }
 0x113   : > { %942 = vrot.lane.b32.xlu1 %v3313_v51, %s2484_s18 }
 0x114   : > { %940 = vrot.lane.b32.xlu0 %v3316_v26, %s2484_s18  ;;  %v3324_v11 = vpop.permute.xlu2 %847 }
 0x115   : > { %4797 = vst [vmem:[#allocation116_spill] sm:$0xff] %v3324_v11  ;;  %v3326_v36 = vpop.permute.xlu1 %827  ;;  %v4804_v11 = vld [vmem:[#allocation14_spill] sm:$0xff] }
 0x116   : > { %4798 = vst [vmem:[#allocation117_spill] sm:$0xff] %v3326_v36  ;;  %v3328_v9 = vpop.permute.xlu0 %825 }
 0x117   : > { %4799 = vst [vmem:[#allocation118_spill] sm:$0xff] %v3328_v9 }
 0x11a   : > { %988 = vrot.lane.b32.xlu2 %v2653_v46, %s2485_s19 }
 0x11b   : > { %986 = vrot.lane.b32.xlu1 %v2631_v32, %s2485_s19 }
 0x11c   : > { %984 = vrot.lane.b32.xlu0 %v2665_v50, %s2485_s19  ;;  %v3336_v35 = vpop.permute.xlu2 %884 }
 0x11d   : > { %4800 = vst [vmem:[#allocation119_spill] sm:$0xff] %v3336_v35  ;;  %v3338_v30 = vpop.permute.xlu1 %833  ;;  %v4808_v35 = vld [vmem:[#allocation21_spill] sm:$0xff] }
 0x11e   : > { %4801 = vst [vmem:[#allocation120_spill] sm:$0xff] %v3338_v30  ;;  %v3340_v21 = vpop.permute.xlu0 %831  ;;  %v4810_v30 = vld [vmem:[#allocation17_spill] sm:$0xff] }
 0x11f   : > { %4802 = vst [vmem:[#allocation121_spill] sm:$0xff] %v3340_v21  ;;  %v4809_v21 = vld [vmem:[#allocation16_spill] sm:$0xff] }
 0x122   : > { %994 = vrot.lane.b32.xlu2 %v2699_v4, %s2485_s19 }
 0x123   : > { %992 = vrot.lane.b32.xlu1 %v4803_v42, %s2485_s19 }
 0x124   : > { %990 = vrot.lane.b32.xlu0 %v4804_v11, %s2485_s19  ;;  %v3348_v9 = vpop.permute.xlu2 %890 }
 0x125   : > { %4805 = vst [vmem:[#allocation15_spill] sm:$0xff] %v3348_v9  ;;  %v3350_v36 = vpop.permute.xlu1 %839  ;;  %v4813_v9 = vld [vmem:[#allocation26_spill] sm:$0xff] }
 0x126   : > { %4806 = vst [vmem:[#allocation14_spill] sm:$0xff] %v3350_v36  ;;  %v3352_v50 = vpop.permute.xlu0 %837  ;;  %v4814_v36 = vld [vmem:[#allocation18_spill] sm:$0xff] }
 0x127   : > { %4807 = vst [vmem:[#allocation122_spill] sm:$0xff] %v3352_v50  ;;  %v4815_v50 = vld [vmem:[#allocation19_spill] sm:$0xff] }
 0x12a   : > { %1000 = vrot.lane.b32.xlu2 %v4808_v35, %s2485_s19 }
 0x12b   : > { %998 = vrot.lane.b32.xlu1 %v4809_v21, %s2485_s19 }
 0x12c   : > { %996 = vrot.lane.b32.xlu0 %v4810_v30, %s2485_s19  ;;  %v3360_v63 = vpop.permute.xlu2 %896 }
 0x12d   : > { %v3362_v1 = vpop.permute.xlu1 %845 }
 0x12e   : > { %4811 = vst [vmem:[#allocation123_spill] sm:$0xff] %v3362_v1  ;;  %v3364_v52 = vpop.permute.xlu0 %843  ;;  %v4820_v1 = vld [vmem:[#allocation23_spill] sm:$0xff] }
 0x12f   : > { %4812 = vst [vmem:[#allocation124_spill] sm:$0xff] %v3364_v52  ;;  %v4821_v52 = vld [vmem:[#allocation24_spill] sm:$0xff] }
 0x132   : > { %1006 = vrot.lane.b32.xlu2 %v4813_v9, %s2485_s19 }
 0x133   : > { %1004 = vrot.lane.b32.xlu1 %v4814_v36, %s2485_s19 }
 0x134   : > { %1002 = vrot.lane.b32.xlu0 %v4815_v50, %s2485_s19  ;;  %v3372_v35 = vpop.permute.xlu2 %902 }
 0x135   : > { %4816 = vst [vmem:[#allocation26_spill] sm:$0xff] %v3372_v35  ;;  %v3374_v21 = vpop.permute.xlu1 %882  ;;  %v4825_v35 = vld [vmem:[#allocation35_spill] sm:$0xff] }
 0x136   : > { %4817 = vst [vmem:[#allocation18_spill] sm:$0xff] %v3374_v21  ;;  %v3376_v30 = vpop.permute.xlu0 %880  ;;  %v4826_v21 = vld [vmem:[#allocation27_spill] sm:$0xff] }
 0x137   : > { %4818 = vst [vmem:[#allocation19_spill] sm:$0xff] %v3376_v30 }
 0x13a   : > { %1012 = vrot.lane.b32.xlu2 %v4819_v59, %s2485_s19  ;;  %v4827_v59 = vld [vmem:[#allocation28_spill] sm:$0xff] }
 0x13b   : > { %1010 = vrot.lane.b32.xlu1 %v4820_v1, %s2485_s19 }
 0x13c   : > { %1008 = vrot.lane.b32.xlu0 %v4821_v52, %s2485_s19  ;;  %v3384_v8 = vpop.permute.xlu2 %908 }
 0x13d   : > { %4822 = vst [vmem:[#allocation125_spill] sm:$0xff] %v3384_v8  ;;  %v3386_v37 = vpop.permute.xlu1 %888  ;;  %v4830_v8 = vld [vmem:[#allocation41_spill] sm:$0xff] }
 0x13e   : > { %4823 = vst [vmem:[#allocation126_spill] sm:$0xff] %v3386_v37  ;;  %v3388_v33 = vpop.permute.xlu0 %886  ;;  %v4831_v37 = vld [vmem:[#allocation31_spill] sm:$0xff] }
 0x13f   : > { %4824 = vst [vmem:[#allocation127_spill] sm:$0xff] %v3388_v33  ;;  %v4832_v33 = vld [vmem:[#allocation32_spill] sm:$0xff] }
 0x142   : > { %1018 = vrot.lane.b32.xlu2 %v4825_v35, %s2485_s19 }
 0x143   : > { %1016 = vrot.lane.b32.xlu1 %v4826_v21, %s2485_s19 }
 0x144   : > { %1014 = vrot.lane.b32.xlu0 %v4827_v59, %s2485_s19  ;;  %v3396_v30 = vpop.permute.xlu2 %914 }
 0x145   : > { %4828 = vst [vmem:[#allocation35_spill] sm:$0xff] %v3396_v30  ;;  %v3398_v1 = vpop.permute.xlu1 %894 }
 0x146   : > { %v3400_v52 = vpop.permute.xlu0 %892 }
 0x147   : > { %4829 = vst [vmem:[#allocation128_spill] sm:$0xff] %v3400_v52  ;;  %v4834_v52 = vld [vmem:[#allocation36_spill] sm:$0xff] }
 0x14a   : > { %1024 = vrot.lane.b32.xlu2 %v4830_v8, %s2485_s19  ;;  %v4835_v8 = vld [vmem:[#allocation37_spill] sm:$0xff] }
 0x14b   : > { %1022 = vrot.lane.b32.xlu1 %v4831_v37, %s2485_s19 }
 0x14c   : > { %1020 = vrot.lane.b32.xlu0 %v4832_v33, %s2485_s19  ;;  %v3408_v6 = vpop.permute.xlu2 %920 }
 0x14d   : > { %4833 = vst [vmem:[#allocation129_spill] sm:$0xff] %v3408_v6  ;;  %v3410_v21 = vpop.permute.xlu1 %900  ;;  %v978_v6 = vrot.slane %v3313_v51, 1 }
 0x14e   : > { %v3412_v59 = vpop.permute.xlu0 %898 }
 0x152   : > { %1030 = vrot.lane.b32.xlu2 %v2915_v0, %s2485_s19  ;;  %v977_v0 = vrot.slane %v3316_v26, 1  ;;  %v4841_v26 = vrot.slane %v3295_v24, 7 }
 0x153   : > { %1028 = vrot.lane.b32.xlu1 %v4834_v52, %s2485_s19 }
 0x154   : > { %1026 = vrot.lane.b32.xlu0 %v4835_v8, %s2485_s19  ;;  %v3420_v30 = vpop.permute.xlu2 %926 }
 0x155   : > { %4836 = vst [vmem:[#allocation130_spill] sm:$0xff] %v3420_v30  ;;  %v3422_v37 = vpop.permute.xlu1 %906  ;;  %v468_v30 = vrot.slane %v3295_v24, 6 }
 0x156   : > { %v3424_v33 = vpop.permute.xlu0 %904 }
 0x157   : > { %4837 = vst [vmem:[#allocation131_spill] sm:$0xff] %v3424_v33  ;;  %v3449_v51 = vsel %vm357_vm0, %v4841_v26, %v468_v30  ;;  %v4847_v26 = vld [vmem:[#allocation52_spill] sm:$0xff] }
 0x158   : > { %4842 = vst [vmem:[#allocation135_spill] sm:$0xff] %v3449_v51 }
 0x15a   : > { %1036 = vrot.lane.b32.xlu2 %v2940_v25, %s2485_s19  ;;  %v3442_v25 = vsel %vm547_vm1, %v977_v0, %v978_v6  ;;  %v980_v0 = vrot.slane %v3449_v51, 1  ;;  %v4855_v51 = vld [vmem:[#allocation56_spill] sm:$0xff] }
 0x15b   : > { %1034 = vrot.lane.b32.xlu1 %v2903_v44, %s2485_s19  ;;  %4840 = vst [vmem:[#allocation134_spill] sm:$0xff] %v3442_v25 }
 0x15c   : > { %1032 = vrot.lane.b32.xlu0 %v2906_v28, %s2485_s19  ;;  %v3434_v52 = vpop.permute.xlu2 %932 }
 0x15d   : > { %4838 = vst [vmem:[#allocation132_spill] sm:$0xff] %v3434_v52  ;;  %v3436_v8 = vpop.permute.xlu1 %912  ;;  %v4843_v52 = vld [vmem:[#allocation49_spill] sm:$0xff] }
 0x15e   : > { %v3439_v33 = vpop.permute.xlu0 %910 }
 0x15f   : > { %4839 = vst [vmem:[#allocation133_spill] sm:$0xff] %v3439_v33 }
 0x162   : > { %1042 = vrot.lane.b32.xlu2 %v3442_v25, %s2485_s19  ;;  %v3463_v25 = vsel %vm547_vm1, %v978_v6, %v980_v0 }
 0x163   : > { %1040 = vrot.lane.b32.xlu1 %v2934_v10, %s2485_s19  ;;  %4846 = vst [vmem:[#allocation138_spill] sm:$0xff] %v3463_v25 }
 0x164   : > { %1038 = vrot.lane.b32.xlu0 %v4843_v52, %s2485_s19  ;;  %v3455_v28 = vpop.permute.xlu2 %938 }
 0x165   : > { %4844 = vst [vmem:[#allocation136_spill] sm:$0xff] %v3455_v28  ;;  %v3457_v44 = vpop.permute.xlu1 %918 }
 0x166   : > { %v3460_v33 = vpop.permute.xlu0 %916 }
 0x167   : > { %4845 = vst [vmem:[#allocation137_spill] sm:$0xff] %v3460_v33 }
 0x16a   : > { %1085 = vrot.lane.b32.xlu2 %v2957_v43, %s2486_s20  ;;  %v4851_v43 = vld [vmem:[#allocation51_spill] sm:$0xff] }
 0x16b   : > { %1083 = vrot.lane.b32.xlu1 %v4847_v26, %s2486_s20 }
 0x16c   : > { %1044 = vrot.lane.b32.xlu0 %v3463_v25, %s2485_s19  ;;  %v3471_v24 = vpop.permute.xlu2 %982  ;;  %v4856_v25 = vld [vmem:[#allocation53_spill] sm:$0xff] }
 0x16d   : > { %4848 = vst [vmem:[#allocation52_spill] sm:$0xff] %v3471_v24  ;;  %v3473_v30 = vpop.permute.xlu1 %924 }
 0x16e   : > { %4849 = vst [vmem:[#allocation139_spill] sm:$0xff] %v3473_v30  ;;  %v3475_v28 = vpop.permute.xlu0 %922 }
 0x16f   : > { %4850 = vst [vmem:[#allocation140_spill] sm:$0xff] %v3475_v28 }
 0x172   : > { %1091 = vrot.lane.b32.xlu2 %v2976_v17, %s2486_s20 }
 0x173   : > { %1089 = vrot.lane.b32.xlu1 %v2979_v40, %s2486_s20 }
 0x174   : > { %1087 = vrot.lane.b32.xlu0 %v4851_v43, %s2486_s20  ;;  %v3483_v6 = vpop.permute.xlu2 %988 }
 0x175   : > { %4852 = vst [vmem:[#allocation51_spill] sm:$0xff] %v3483_v6  ;;  %v3485_v0 = vpop.permute.xlu1 %930  ;;  %v4861_v6 = vld [vmem:[#allocation55_spill] sm:$0xff] }
 0x176   : > { %4853 = vst [vmem:[#allocation141_spill] sm:$0xff] %v3485_v0  ;;  %v3487_v26 = vpop.permute.xlu0 %928  ;;  %v4860_v0 = vld [vmem:[#allocation59_spill] sm:$0xff] }
 0x177   : > { %4854 = vst [vmem:[#allocation142_spill] sm:$0xff] %v3487_v26 }
 0x17a   : > { %1097 = vrot.lane.b32.xlu2 %v4855_v51, %s2486_s20 }
 0x17b   : > { %1095 = vrot.lane.b32.xlu1 %v3001_v34, %s2486_s20 }
 0x17c   : > { %1093 = vrot.lane.b32.xlu0 %v4856_v25, %s2486_s20  ;;  %v3495_v10 = vpop.permute.xlu2 %994 }
 0x17d   : > { %4857 = vst [vmem:[#allocation53_spill] sm:$0xff] %v3495_v10  ;;  %v3497_v52 = vpop.permute.xlu1 %936  ;;  %v4864_v10 = vld [vmem:[#allocation62_spill] sm:$0xff] }
 0x17e   : > { %4858 = vst [vmem:[#allocation143_spill] sm:$0xff] %v3497_v52  ;;  %v3499_v24 = vpop.permute.xlu0 %934  ;;  %v4865_v52 = vld [vmem:[#allocation58_spill] sm:$0xff] }
 0x17f   : > { %4859 = vst [vmem:[#allocation144_spill] sm:$0xff] %v3499_v24 }
 0x182   : > { %1103 = vrot.lane.b32.xlu2 %v3019_v18, %s2486_s20 }
 0x183   : > { %1101 = vrot.lane.b32.xlu1 %v4860_v0, %s2486_s20 }
 0x184   : > { %1099 = vrot.lane.b32.xlu0 %v4861_v6, %s2486_s20  ;;  %v3507_v26 = vpop.permute.xlu2 %1000 }
 0x185   : > { %v3509_v28 = vpop.permute.xlu1 %942 }
 0x186   : > { %4862 = vst [vmem:[#allocation145_spill] sm:$0xff] %v3509_v28  ;;  %v3511_v33 = vpop.permute.xlu0 %940  ;;  %v4869_v28 = vld [vmem:[#allocation68_spill] sm:$0xff] }
 0x187   : > { %4863 = vst [vmem:[#allocation146_spill] sm:$0xff] %v3511_v33  ;;  %v4870_v33 = vld [vmem:[#allocation61_spill] sm:$0xff] }
 0x18a   : > { %1109 = vrot.lane.b32.xlu2 %v4864_v10, %s2486_s20 }
 0x18b   : > { %1107 = vrot.lane.b32.xlu1 %v3044_v39, %s2486_s20 }
 0x18c   : > { %1105 = vrot.lane.b32.xlu0 %v4865_v52, %s2486_s20  ;;  %v3519_v24 = vpop.permute.xlu2 %1006 }
 0x18d   : > { %4866 = vst [vmem:[#allocation58_spill] sm:$0xff] %v3519_v24  ;;  %v3521_v0 = vpop.permute.xlu1 %986 }
 0x18e   : > { %4867 = vst [vmem:[#allocation147_spill] sm:$0xff] %v3521_v0  ;;  %v3523_v6 = vpop.permute.xlu0 %984 }
 0x18f   : > { %4868 = vst [vmem:[#allocation148_spill] sm:$0xff] %v3523_v6 }
 0x192   : > { %1115 = vrot.lane.b32.xlu2 %v3066_v27, %s2486_s20  ;;  %v4874_v27 = vld [vmem:[#allocation66_spill] sm:$0xff] }
 0x193   : > { %1113 = vrot.lane.b32.xlu1 %v4869_v28, %s2486_s20 }
 0x194   : > { %1111 = vrot.lane.b32.xlu0 %v4870_v33, %s2486_s20  ;;  %v3531_v10 = vpop.permute.xlu2 %1012 }
 0x195   : > { %4871 = vst [vmem:[#allocation149_spill] sm:$0xff] %v3531_v10  ;;  %v3533_v51 = vpop.permute.xlu1 %992 }
 0x196   : > { %4872 = vst [vmem:[#allocation150_spill] sm:$0xff] %v3533_v51  ;;  %v3535_v30 = vpop.permute.xlu0 %990  ;;  %v4875_v51 = vld [vmem:[#allocation78_spill] sm:$0xff] }
 0x197   : > { %4873 = vst [vmem:[#allocation151_spill] sm:$0xff] %v3535_v30  ;;  %v4876_v30 = vld [vmem:[#allocation72_spill] sm:$0xff] }
 0x19a   : > { %1121 = vrot.lane.b32.xlu2 %v3092_v29, %s2486_s20 }
 0x19b   : > { %1119 = vrot.lane.b32.xlu1 %v3095_v62, %s2486_s20 }
 0x19c   : > { %1117 = vrot.lane.b32.xlu0 %v4874_v27, %s2486_s20  ;;  %v3543_v0 = vpop.permute.xlu2 %1018  ;;  %v4877_v27 = vld [vmem:[#allocation76_spill] sm:$0xff] }
 0x19d   : > { %v3545_v28 = vpop.permute.xlu1 %998 }
 0x19e   : > { %v997_v33 = vpop.permute.xlu0 %996 }
 0x1a2   : > { %1127 = vrot.lane.b32.xlu2 %v3117_v3, %s2486_s20 }
 0x1a3   : > { %1125 = vrot.lane.b32.xlu1 %v4875_v51, %s2486_s20 }
 0x1a4   : > { %1123 = vrot.lane.b32.xlu0 %v4876_v30, %s2486_s20  ;;  %v3553_v6 = vpop.permute.xlu2 %1024 }
 0x1a5   : > { %v3555_v10 = vpop.permute.xlu1 %1004 }
 0x1a6   : > { %v1003_v24 = vpop.permute.xlu0 %1002 }
 0x1aa   : > { %1179 = vrot.lane.b32.xlu2 %v2601_v15, %s2487_s21 }
 0x1ab   : > { %1131 = vrot.lane.b32.xlu1 %v3146_v60, %s2486_s20 }
 0x1ac   : > { %1129 = vrot.lane.b32.xlu0 %v4877_v27, %s2486_s20  ;;  %v3563_v3 = vpop.permute.xlu2 %1030 }
 0x1ad   : > { %v3565_v51 = vpop.permute.xlu1 %1010 }
 0x1ae   : > { %v1009_v30 = vpop.permute.xlu0 %1008 }
 0x1b2   : > { %1181 = vrot.lane.b32.xlu2 %v2606_v19, %s2487_s21 }
 0x1b3   : > { %1359 = vrot.lane.b32.xlu1 %v4851_v43, %s2488_s22 }
 0x1b4   : > { %1269 = vrot.lane.b32.xlu0 %v2631_v32, %s2489_s23  ;;  %v3573_v60 = vpop.permute.xlu2 %1036 }
 0x1b5   : > { %4878 = vst [vmem:[#allocation152_spill] sm:$0xff] %v3573_v60  ;;  %v3575_v15 = vpop.permute.xlu1 %1016 }
 0x1b6   : > { %v3577_v27 = vpop.permute.xlu0 %1014 }
 0x1ba   : > { %1183 = vrot.lane.b32.xlu2 %v2598_v14, %s2487_s21  ;;  %v4882_v14 = vld [vmem:[#allocation57_spill] sm:$0xff] }
 0x1bb   : > { %1361 = vrot.lane.b32.xlu1 %v2979_v40, %s2488_s22 }
 0x1bc   : > { %1271 = vrot.lane.b32.xlu0 %v2653_v46, %s2489_s23  ;;  %v3585_v43 = vpop.permute.xlu2 %1042 }
 0x1bd   : > { %4879 = vst [vmem:[#allocation153_spill] sm:$0xff] %v3585_v43  ;;  %v3587_v19 = vpop.permute.xlu1 %1022 }
 0x1be   : > { %v3589_v32 = vpop.permute.xlu0 %1020 }
 0x1c2   : > { %1285 = vrot.lane.b32.xlu2 %v4815_v50, %s2489_s23 }
 0x1c3   : > { %1273 = vrot.lane.b32.xlu1 %v4804_v11, %s2489_s23 }
 0x1c4   : > { %1195 = vrot.lane.b32.xlu0 %v2702_v5, %s2487_s21  ;;  %v3597_v60 = vpop.permute.xlu2 %1085 }
 0x1c5   : > { %4880 = vst [vmem:[#allocation154_spill] sm:$0xff] %v3597_v60  ;;  %v3599_v40 = vpop.permute.xlu1 %1028  ;;  %v1455_v60 = vsel %vm1449_vm3, %v2595_v13, %v4882_v14 }
 0x1c6   : > { %4881 = vst [vmem:[#allocation155_spill] sm:$0xff] %v3599_v40  ;;  %v3601_v46 = vpop.permute.xlu0 %1026  ;;  %v1486_v40 = vsel %vm1480_vm4, %v1455_v60, %v3215_v20  ;;  %v4883_v20 = vld [vmem:[#allocation60_spill] sm:$0xff] }
 0x1ca   : > { %1185 = vrot.lane.b32.xlu2 %v2595_v13, %s2487_s21 }
 0x1cb   : > { %1375 = vrot.lane.b32.xlu1 %v3019_v18, %s2488_s22 }
 0x1cc   : > { %1363 = vrot.lane.b32.xlu0 %v2976_v17, %s2488_s22  ;;  %v3609_v50 = vpop.permute.xlu2 %1091  ;;  %v1519_v17 = vsel %vm1511_vm5, %v1486_v40, %v3398_v1  ;;  %v1458_v1 = vsel %vm1449_vm3, %v2659_v48, %v4883_v20 }
 0x1cd   : > { %v3611_v11 = vpop.permute.xlu1 %1034  ;;  %v1552_v18 = vsel %vm1544_vm6, %v1519_v17, %v997_v33 }
 0x1ce   : > { %v3613_v43 = vpop.permute.xlu0 %1032 }
 0x1d2   : > { %1287 = vrot.lane.b32.xlu2 %v4814_v36, %s2489_s23 }
 0x1d3   : > { %1275 = vrot.lane.b32.xlu1 %v4803_v42, %s2489_s23  ;;  %v1489_v42 = vsel %vm1480_vm4, %v1458_v1, %v3227_v57 }
 0x1d4   : > { %1197 = vrot.lane.b32.xlu0 %v2693_v2, %s2487_s21  ;;  %v1098_v13 = vpop.permute.xlu2 %1097  ;;  %v1522_v33 = vsel %vm1511_vm5, %v1489_v42, %v3410_v21 }
 0x1d5   : > { %v3629_v14 = vpop.permute.xlu1 %1040  ;;  %v3632_v60 = vsel %vm1577_vm7, %v1552_v18, %v1098_v13  ;;  %v1555_v40 = vsel %vm1544_vm6, %v1522_v33, %v1003_v24  ;;  %v4885_v33 = vld [vmem:[#allocation69_spill] sm:$0xff] }
 0x1d6   : > { %v3634_v36 = vpop.permute.xlu0 %1038 }
 0x1da   : > { %1377 = vrot.lane.b32.xlu2 %v4865_v52, %s2488_s22  ;;  %v4884_v52 = vld [vmem:[#allocation63_spill] sm:$0xff] }
 0x1db   : > { %1365 = vrot.lane.b32.xlu1 %v4856_v25, %s2488_s22  ;;  %v1461_v21 = vsel %vm1449_vm3, %v2693_v2, %v4884_v52 }
 0x1dc   : > { %1211 = vrot.lane.b32.xlu0 %v2819_v16, %s2487_s21  ;;  %v1104_v17 = vpop.permute.xlu2 %1103  ;;  %v1492_v25 = vsel %vm1480_vm4, %v1461_v21, %v3239_v38  ;;  %v4887_v21 = vld [vmem:[#allocation74_spill] sm:$0xff] }
 0x1dd   : > { %v3650_v18 = vpop.permute.xlu1 %1083  ;;  %v3653_v13 = vsel %vm1577_vm7, %v1555_v40, %v1104_v17  ;;  %v1525_v24 = vsel %vm1511_vm5, %v1492_v25, %v3422_v37  ;;  %v1464_v37 = vsel %vm1449_vm3, %v2731_v31, %v4885_v33  ;;  %v4888_v25 = vld [vmem:[#allocation75_spill] sm:$0xff] }
 0x1de   : > { %v3655_v57 = vpop.permute.xlu0 %1044  ;;  %v1558_v20 = vsel %vm1544_vm6, %v1525_v24, %v1009_v30  ;;  %v1456_v24 = vsel %vm1449_vm3, %v2675_v54, %v4888_v25 }
 0x1df   : > { %v1487_v33 = vsel %vm1480_vm4, %v1456_v24, %v3267_v12 }
 0x1e2   : > { %1187 = vrot.lane.b32.xlu2 %v2675_v54, %s2487_s21 }
 0x1e3   : > { %1391 = vrot.lane.b32.xlu1 %v3095_v62, %s2488_s22  ;;  %v1495_v62 = vsel %vm1480_vm4, %v1464_v37, %v3251_v22 }
 0x1e4   : > { %1301 = vrot.lane.b32.xlu0 %v4825_v35, %s2489_s23  ;;  %v1110_v1 = vpop.permute.xlu2 %1109  ;;  %v1528_v35 = vsel %vm1511_vm5, %v1495_v62, %v3436_v8 }
 0x1e5   : > { %v3671_v42 = vpop.permute.xlu1 %1089  ;;  %v3674_v2 = vsel %vm1577_vm7, %v1558_v20, %v1110_v1  ;;  %v1561_v30 = vsel %vm1544_vm6, %v1528_v35, %v3577_v27  ;;  %v4889_v35 = vld [vmem:[#allocation79_spill] sm:$0xff] }
 0x1e6   : > { %v3676_v38 = vpop.permute.xlu0 %1087 }
 0x1ea   : > { %1289 = vrot.lane.b32.xlu2 %v4813_v9, %s2489_s23  ;;  %v4886_v9 = vld [vmem:[#allocation73_spill] sm:$0xff] }
 0x1eb   : > { %1277 = vrot.lane.b32.xlu1 %v2699_v4, %s2489_s23  ;;  %v1467_v8 = vsel %vm1449_vm3, %v2765_v61, %v4886_v9  ;;  %v1457_v4 = vsel %vm1449_vm3, %v2662_v49, %v4887_v21 }
 0x1ec   : > { %1199 = vrot.lane.b32.xlu0 %v2747_v41, %s2487_s21  ;;  %v1116_v40 = vpop.permute.xlu2 %1115  ;;  %v1498_v27 = vsel %vm1480_vm4, %v1467_v8, %v3263_v45  ;;  %v1488_v20 = vsel %vm1480_vm4, %v1457_v4, %v3265_v56  ;;  %v1520_v56 = vsel %vm1511_vm5, %v1487_v33, %v3360_v63  ;;  %v1470_v63 = vsel %vm1449_vm3, %v2803_v53, %v3130_v58  ;;  %v4891_v8 = vld [vmem:[#allocation139_spill] sm:$0xff] }
 0x1ed   : > { %v3693_v17 = vpop.permute.xlu1 %1095  ;;  %v3696_v22 = vsel %vm1577_vm7, %v1561_v30, %v1116_v40  ;;  %v1531_v1 = vsel %vm1511_vm5, %v1498_v27, %v3457_v44  ;;  %v1521_v45 = vsel %vm1511_vm5, %v1488_v20, %v3412_v59  ;;  %v1553_v59 = vsel %vm1544_vm6, %v1520_v56, %v3545_v28  ;;  %v4890_v28 = vld [vmem:[#allocation80_spill] sm:$0xff]  ;;  %v4896_v20 = vld [vmem:[#allocation58_spill] sm:$0xff] }
 0x1ee   : > { %v3698_v52 = vpop.permute.xlu0 %1093  ;;  %v1554_v44 = vsel %vm1544_vm6, %v1521_v45, %v3507_v26  ;;  %v1460_v26 = vsel %vm1449_vm3, %v2702_v5, %v4889_v35  ;;  %v1501_v30 = vsel %vm1480_vm4, %v1470_v63, %v3275_v23  ;;  %v1459_v40 = vsel %vm1449_vm3, %v2656_v47, %v4890_v28  ;;  %v4892_v5 = vld [vmem:[#allocation107_spill] sm:$0xff]  ;;  %v4894_v27 = vld [vmem:[#allocation32_spill] sm:$0xff]  ;;  %v4900_v35 = vld [vmem:[#allocation86_spill] sm:$0xff] }
 0x1ef   : > { %v1491_v9 = vsel %vm1480_vm4, %v1460_v26, %v3277_v7  ;;  %v1534_v58 = vsel %vm1511_vm5, %v1501_v30, %v4891_v8  ;;  %v1490_v21 = vsel %vm1480_vm4, %v1459_v40, %v4892_v5  ;;  %v4893_v23 = vld [vmem:[#allocation131_spill] sm:$0xff]  ;;  %v4895_v7 = vld [vmem:[#allocation26_spill] sm:$0xff]  ;;  %v1713_v56 = vld [vmem:[%s4559_s1 + $0x20] sm:$0xf]  ;;  %v1462_v26 = vsel %vm1449_vm3, %v2747_v41, %v4900_v35 }
 0x1f0   : > { %v1524_v4 = vsel %vm1511_vm5, %v1491_v9, %v4893_v23  ;;  %v1523_v24 = vsel %vm1511_vm5, %v1490_v21, %v4895_v7  ;;  %2244 = vmatpush.msk.msra.mxu0 %vm1815_vm8, %v1713_v56  ;;  %2284 = vmatpush.msk.msra.mxu1 %vm1815_vm8, %v1713_v56  ;;  %v4899_v63 = vld [vmem:[#allocation24_spill] sm:$0xff]  ;;  %v4901_v30 = vld [vmem:[#allocation109_spill] sm:$0xff]  ;;  %v4903_v9 = vld [vmem:[#allocation110_spill] sm:$0xff] }
 0x1f1   : > { %v1556_v45 = vsel %vm1544_vm6, %v1523_v24, %v3555_v10  ;;  %v1711_v10 = vld [vmem:[%s4559_s1 + $0x10] sm:$0xff]  ;;  %2285 = vmatpush.msk.msra.mxu2 %vm1815_vm8, %v1713_v56  ;;  %2286 = vmatpush.msk.msra.mxu3 %vm1815_vm8, %v1713_v56  ;;  %v4902_v40 = vld [vmem:[#allocation17_spill] sm:$0xff]  ;;  %v1493_v8 = vsel %vm1480_vm4, %v1462_v26, %v4903_v9  ;;  %v4909_v56 = vld [vmem:[#allocation56_spill] sm:$0xff] }
 0x1f2   : > { %1379 = vrot.lane.b32.xlu2 %v3044_v39, %s2488_s22  ;;  %v1564_v39 = vsel %vm1544_vm6, %v1531_v1, %v3589_v32  ;;  %v1557_v1 = vsel %vm1544_vm6, %v1524_v4, %v4896_v20  ;;  %v1710_v41 = vld [vmem:[%s4559_s1 + $0x8] sm:$0xff]  ;;  %v4913_v35 = vld [vmem:[#allocation39_spill] sm:$0xff] }
 0x1f3   : > { %1367 = vrot.lane.b32.xlu1 %v3001_v34, %s2488_s22  ;;  %v4905_v23 = vld [vmem:[#allocation125_spill] sm:$0xff]  ;;  %v4916_v9 = vld [vmem:[#allocation35_spill] sm:$0xff] }
 0x1f4   : > { %1213 = vrot.lane.b32.xlu0 %v2806_v55, %s2487_s21  ;;  %v1122_v54 = vpop.permute.xlu2 %1121  ;;  %v1526_v4 = vsel %vm1511_vm5, %v1493_v8, %v4905_v23 }
 0x1f5   : > { %v1102_v34 = vpop.permute.xlu1 %1101  ;;  %v3732_v37 = vsel %vm1577_vm7, %v1564_v39, %v1122_v54  ;;  %v1559_v7 = vsel %vm1544_vm6, %v1526_v4, %v3565_v51  ;;  %v4907_v51 = vld [vmem:[#allocation91_spill] sm:$0xff] }
 0x1f6   : > { %v3737_v12 = vsel %vm1577_vm7, %v1554_v44, %v1102_v34  ;;  %v1100_v32 = vpop.permute.xlu0 %1099  ;;  %v1712_v44 = vld [vmem:[%s4559_s1 + $0x18] sm:$0xff]  ;;  %v4897_v34 = vld [vmem:[#allocation85_spill] sm:$0xff] }
 0x1f7   : > { %v3740_v62 = vsel %vm1577_vm7, %v1553_v59, %v1100_v32  ;;  %v4898_v59 = vld [vmem:[#allocation22_spill] sm:$0xff]  ;;  %1831 = vmatpush.msra.mxu0 %v1712_v44  ;;  %2287 = vmatpush.msra.mxu1 %v1712_v44 }
 0x1f8   : > { %v1463_v32 = vsel %vm1449_vm3, %v4898_v59, %v4897_v34  ;;  %2288 = vmatpush.msra.mxu2 %v1712_v44  ;;  %2289 = vmatpush.msra.mxu3 %v1712_v44  ;;  %v4910_v44 = vld [vmem:[#allocation92_spill] sm:$0xff] }
 0x1f9   : > { %v1494_v28 = vsel %vm1480_vm4, %v1463_v32, %v4901_v30  ;;  %1832 = vmatpush.msra.mxu0 %v1711_v10  ;;  %2290 = vmatpush.msra.mxu1 %v1711_v10  ;;  %v4911_v34 = vld [vmem:[#allocation20_spill] sm:$0xff]  ;;  %v4915_v30 = vld [vmem:[#allocation137_spill] sm:$0xff] }
 0x1fa   : > { %1189 = vrot.lane.b32.xlu2 %v2662_v49, %s2487_s21  ;;  %v1567_v49 = vsel %vm1544_vm6, %v1534_v58, %v3601_v46  ;;  %v4904_v58 = vld [vmem:[#allocation133_spill] sm:$0xff]  ;;  %2291 = vmatpush.msra.mxu2 %v1711_v10  ;;  %v4912_v32 = vld [vmem:[#allocation112_spill] sm:$0xff] }
 0x1fb   : > { %1393 = vrot.lane.b32.xlu1 %v3092_v29, %s2488_s22  ;;  %v1527_v5 = vsel %vm1511_vm5, %v1494_v28, %v4904_v58  ;;  %1833 = vmatpush.msra.mxu0 %v1710_v41 }
 0x1fc   : > { %1303 = vrot.lane.b32.xlu0 %v4894_v27, %s2489_s23  ;;  %v1128_v25 = vpop.permute.xlu2 %1127  ;;  %2293 = vmatpush.msra.mxu1 %v1710_v41 }
 0x1fd   : > { %v1108_v29 = vpop.permute.xlu1 %1107  ;;  %v3774_v33 = vsel %vm1577_vm7, %v1567_v49, %v1128_v25  ;;  %v4906_v49 = vld [vmem:[#allocation149_spill] sm:$0xff]  ;;  %2292 = vmatpush.msra.mxu3 %v1711_v10  ;;  %2294 = vmatpush.msra.mxu2 %v1710_v41 }
 0x1fe   : > { %v3779_v39 = vsel %vm1577_vm7, %v1557_v1, %v1108_v29  ;;  %v1106_v46 = vpop.permute.xlu0 %1105  ;;  %v1560_v27 = vsel %vm1544_vm6, %v1527_v5, %v4906_v49  ;;  %v1709_v29 = vld [vmem:[%s4559_s1] sm:$0xff] }
 0x1ff   : > { %v3782_v54 = vsel %vm1577_vm7, %v1556_v45, %v1106_v46  ;;  %1834 = vmatpush.msra.mxu0 %v1709_v29  ;;  %2296 = vmatpush.msra.mxu1 %v1709_v29  ;;  %v4908_v45 = vld [vmem:[#allocation25_spill] sm:$0xff] }
 0x200   : > { %v1466_v46 = vsel %vm1449_vm3, %v4908_v45, %v4907_v51  ;;  %2295 = vmatpush.msra.mxu3 %v1710_v41  ;;  %2297 = vmatpush.msra.mxu2 %v1709_v29  ;;  %v4914_v10 = vld [vmem:[#allocation113_spill] sm:$0xff]  ;;  %v4922_v51 = vld [vmem:[#allocation118_spill] sm:$0xff] }
 0x202   : > { %1291 = vrot.lane.b32.xlu2 %v4899_v63, %s2489_s23  ;;  %v1497_v63 = vsel %vm1480_vm4, %v1466_v46, %v4912_v32  ;;  %2298 = vmatpush.msra.mxu3 %v1709_v29  ;;  %v4921_v29 = vld [vmem:[#allocation31_spill] sm:$0xff]  ;;  %v4925_v32 = vld [vmem:[#allocation129_spill] sm:$0xff] }
 0x203   : > { %1279 = vrot.lane.b32.xlu1 %v4902_v40, %s2489_s23  ;;  %v1530_v28 = vsel %vm1511_vm5, %v1497_v63, %v4915_v30 }
 0x204   : > { %1201 = vrot.lane.b32.xlu0 %v4898_v59, %s2487_s21  ;;  %v3811_v21 = vpop.permute.xlu2 %1179  ;;  %v1465_v59 = vsel %vm1449_vm3, %v4911_v34, %v4910_v44  ;;  %v1563_v58 = vsel %vm1544_vm6, %v1530_v28, %v3543_v0 }
 0x205   : > { %v1114_v25 = vpop.permute.xlu1 %1113  ;;  %v1496_v26 = vsel %vm1480_vm4, %v1465_v59, %v4914_v10 }
 0x206   : > { %v3823_v24 = vsel %vm1577_vm7, %v1560_v27, %v1114_v25  ;;  %v1112_v20 = vpop.permute.xlu0 %1111  ;;  %v1529_v8 = vsel %vm1511_vm5, %v1496_v26, %v4916_v9  ;;  %v4918_v25 = vld [vmem:[#allocation43_spill] sm:$0xff] }
 0x207   : > { %v3826_v1 = vsel %vm1577_vm7, %v1559_v7, %v1112_v20  ;;  %v1562_v41 = vsel %vm1544_vm6, %v1529_v8, %v3575_v15  ;;  %v4919_v7 = vld [vmem:[#allocation95_spill] sm:$0xff]  ;;  %v4920_v20 = vld [vmem:[#allocation117_spill] sm:$0xff] }
 0x208   : > { %v1468_v0 = vsel %vm1449_vm3, %v2819_v16, %v4919_v7  ;;  %v4926_v8 = vld [vmem:[#allocation97_spill] sm:$0xff] }
 0x209   : > { %v1499_v46 = vsel %vm1480_vm4, %v1468_v0, %v4922_v51  ;;  %v4933_v0 = vld [vmem:[#allocation142_spill] sm:$0xff] }
 0x20a   : > { %1369 = vrot.lane.b32.xlu2 %v4909_v56, %s2488_s22  ;;  %v4923_v56 = vld [vmem:[#allocation140_spill] sm:$0xff]  ;;  %v1532_v16 = vsel %vm1511_vm5, %v1499_v46, %v4925_v32 }
 0x20b   : > { %1227 = vrot.lane.b32.xlu1 %v4913_v35, %s2487_s21  ;;  %v1565_v26 = vsel %vm1544_vm6, %v1532_v16, %v3587_v19 }
 0x20c   : > { %1215 = vrot.lane.b32.xlu0 %v2803_v53, %s2487_s21  ;;  %v3849_v40 = vpop.permute.xlu2 %1181  ;;  %v4917_v53 = vld [vmem:[#allocation94_spill] sm:$0xff] }
 0x20d   : > { %v1120_v5 = vpop.permute.xlu1 %1119  ;;  %v1469_v27 = vsel %vm1449_vm3, %v2806_v55, %v4917_v53  ;;  %v4924_v55 = vld [vmem:[#allocation62_spill] sm:$0xff]  ;;  %v4930_v53 = vld [vmem:[#allocation120_spill] sm:$0xff] }
 0x20e   : > { %v3858_v23 = vsel %vm1577_vm7, %v1563_v58, %v1120_v5  ;;  %v1118_v4 = vpop.permute.xlu0 %1117  ;;  %v1500_v15 = vsel %vm1480_vm4, %v1469_v27, %v4920_v20  ;;  %v4927_v58 = vld [vmem:[#allocation34_spill] sm:$0xff]  ;;  %v4931_v27 = vld [vmem:[#allocation81_spill] sm:$0xff] }
 0x20f   : > { %v3861_v49 = vsel %vm1577_vm7, %v1562_v41, %v1118_v4  ;;  %v1533_v44 = vsel %vm1511_vm5, %v1500_v15, %v4923_v56  ;;  %v1472_v5 = vsel %vm1449_vm3, %v4927_v58, %v4926_v8  ;;  %v4928_v41 = vld [vmem:[#allocation98_spill] sm:$0xff]  ;;  %v4934_v15 = vld [vmem:[#allocation72_spill] sm:$0xff] }
 0x210   : > { %v1566_v63 = vsel %vm1544_vm6, %v1533_v44, %v3553_v6  ;;  %v4929_v6 = vld [vmem:[#allocation29_spill] sm:$0xff]  ;;  %v1503_v19 = vsel %vm1480_vm4, %v1472_v5, %v4930_v53  ;;  %v4936_v44 = vld [vmem:[#allocation155_spill] sm:$0xff]  ;;  %v4939_v8 = vld [vmem:[#allocation104_spill] sm:$0xff] }
 0x211   : > { %v1471_v4 = vsel %vm1449_vm3, %v4929_v6, %v4928_v41  ;;  %v1536_v20 = vsel %vm1511_vm5, %v1503_v19, %v4933_v0  ;;  %v4941_v41 = vld [vmem:[#allocation19_spill] sm:$0xff]  ;;  %v4942_v53 = vld [vmem:[#allocation82_spill] sm:$0xff]  ;;  %v4943_v19 = vld [vmem:[#allocation52_spill] sm:$0xff] }
 0x212   : > { %1317 = vrot.lane.b32.xlu2 %v4918_v25, %s2489_s23  ;;  %v4932_v25 = vld [vmem:[#allocation121_spill] sm:$0xff]  ;;  %v1569_v46 = vsel %vm1544_vm6, %v1536_v20, %v3563_v3  ;;  %v4940_v3 = vld [vmem:[#allocation16_spill] sm:$0xff] }
 0x213   : > { %1305 = vrot.lane.b32.xlu1 %v4921_v29, %s2489_s23  ;;  %v1502_v7 = vsel %vm1480_vm4, %v1471_v4, %v4932_v25  ;;  %v4935_v29 = vld [vmem:[#allocation130_spill] sm:$0xff] }
 0x214   : > { %1381 = vrot.lane.b32.xlu0 %v4924_v55, %s2488_s22  ;;  %v3881_v59 = vpop.permute.xlu2 %1183  ;;  %v1535_v51 = vsel %vm1511_vm5, %v1502_v7, %v4935_v29 }
 0x215   : > { %v1126_v10 = vpop.permute.xlu1 %1125  ;;  %v1568_v55 = vsel %vm1544_vm6, %v1535_v51, %v4936_v44  ;;  %v4945_v44 = vld [vmem:[#allocation12_spill] sm:$0xff] }
 0x216   : > { %v3890_v30 = vsel %vm1577_vm7, %v1566_v63, %v1126_v10  ;;  %v1124_v28 = vpop.permute.xlu0 %1123  ;;  %v4937_v10 = vld [vmem:[#allocation65_spill] sm:$0xff] }
 0x217   : > { %v3893_v9 = vsel %vm1577_vm7, %v1565_v26, %v1124_v28  ;;  %v4938_v26 = vld [vmem:[#allocation13_spill] sm:$0xff] }
 0x218   : > { %v1450_v28 = vsel %vm1449_vm3, %v4938_v26, %v4937_v10  ;;  %v4948_v10 = vld [vmem:[#allocation18_spill] sm:$0xff]  ;;  %v4949_v26 = vld [vmem:[#allocation148_spill] sm:$0xff] }
 0x219   : > { %v1481_v5 = vsel %vm1480_vm4, %v1450_v28, %v4939_v8  ;;  %v4950_v8 = vld [vmem:[#allocation23_spill] sm:$0xff] }
 0x21a   : > { %1191 = vrot.lane.b32.xlu2 %v2659_v48, %s2487_s21  ;;  %v1512_v4 = vsel %vm1511_vm5, %v1481_v5, %v4941_v41  ;;  %v4951_v41 = vld [vmem:[#allocation154_spill] sm:$0xff] }
 0x21b   : > { %1407 = vrot.lane.b32.xlu1 %v4931_v27, %s2488_s22  ;;  %v1545_v25 = vsel %vm1544_vm6, %v1512_v4, %v4943_v19 }
 0x21c   : > { %1395 = vrot.lane.b32.xlu0 %v4934_v15, %s2488_s22  ;;  %v1286_v48 = vpop.permute.xlu2 %1285  ;;  %v1578_v0 = vsel %vm1577_vm7, %v1545_v25, %v3650_v18 }
 0x21d   : > { %v1132_v56 = vpop.permute.xlu1 %1131  ;;  %v1611_v15 = vsel %vm1610_vm9, %v1578_v0, %v3811_v21 }
 0x21e   : > { %v3920_v32 = vsel %vm1577_vm7, %v1569_v46, %v1132_v56  ;;  %v1130_v16 = vpop.permute.xlu0 %1129  ;;  %v4944_v56 = vld [vmem:[#allocation71_spill] sm:$0xff] }
 0x21f   : > { %v3923_v63 = vsel %vm1577_vm7, %v1568_v55, %v1130_v16  ;;  %v4946_v55 = vld [vmem:[#allocation103_spill] sm:$0xff]  ;;  %v4947_v16 = vld [vmem:[#allocation38_spill] sm:$0xff] }
 0x222   : > { %1281 = vrot.lane.b32.xlu2 %v4940_v3, %s2489_s23 }
 0x223   : > { %1133 = vrot.lane.b32.xlu1 %v4942_v53, %s2486_s20 }
 0x224   : > { %1203 = vrot.lane.b32.xlu0 %v2731_v31, %s2487_s21  ;;  %v3940_v7 = vpop.permute.xlu2 %1185  ;;  %v1451_v31 = vsel %vm1449_vm3, %v4945_v44, %v4944_v56 }
 0x225   : > { %v1360_v20 = vpop.permute.xlu1 %1359  ;;  %v1482_v18 = vsel %vm1480_vm4, %v1451_v31, %v4946_v55 }
 0x226   : > { %v1270_v29 = vpop.permute.xlu0 %1269  ;;  %v1513_v21 = vsel %vm1511_vm5, %v1482_v18, %v4948_v10  ;;  %v4956_v10 = vld [vmem:[#allocation89_spill] sm:$0xff] }
 0x227   : > { %v1644_v51 = vsel %vm1643_vm10, %v1611_v15, %v1270_v29  ;;  %v1546_v28 = vsel %vm1544_vm6, %v1513_v21, %v4949_v26  ;;  %v4953_v29 = vld [vmem:[#allocation61_spill] sm:$0xff]  ;;  %v4957_v21 = vld [vmem:[#allocation147_spill] sm:$0xff] }
 0x228   : > { %v1677_v46 = vsel %vm1676_vm11, %v1644_v51, %v1360_v20  ;;  %v1579_v4 = vsel %vm1577_vm7, %v1546_v28, %v4951_v41  ;;  %v4954_v51 = vld [vmem:[#allocation55_spill] sm:$0xff]  ;;  %v4958_v28 = vld [vmem:[#allocation78_spill] sm:$0xff] }
 0x229   : > { %2245 = vmatmul.msk.f32.vlgmr.msra.gmra.mxu0 %vm1718_vm12, %v1677_v46  ;;  %v1612_v25 = vsel %vm1610_vm9, %v1579_v4, %v3849_v40  ;;  %v4955_v40 = vld [vmem:[#allocation119_spill] sm:$0xff]  ;;  %v4959_v41 = vld [vmem:[#allocation50_spill] sm:$0xff] }
 0x22a   : > { %1229 = vrot.lane.b32.xlu2 %v4947_v16, %s2487_s21  ;;  %v1514_v31 = vsel %vm1511_vm5, %v1481_v5, %v4955_v40 }
 0x22b   : > { %1217 = vrot.lane.b32.xlu1 %v4929_v6, %s2487_s21  ;;  %v4952_v6 = vld [vmem:[#allocation41_spill] sm:$0xff]  ;;  %v1547_v26 = vsel %vm1544_vm6, %v1514_v31, %v4957_v21 }
 0x22c   : > { %1293 = vrot.lane.b32.xlu0 %v4950_v8, %s2489_s23  ;;  %v1288_v3 = vpop.permute.xlu2 %1287  ;;  %v1580_v8 = vsel %vm1577_vm7, %v1547_v26, %v3676_v38 }
 0x22d   : > { %v1362_v19 = vpop.permute.xlu1 %1361  ;;  %v1613_v5 = vsel %vm1610_vm9, %v1580_v8, %v3881_v59 }
 0x22e   : > { %v1272_v0 = vpop.permute.xlu0 %1271 }
 0x22f   : > { %v1645_v20 = vsel %vm1643_vm10, %v1612_v25, %v1272_v0 }
 0x230   : > { %v1678_v15 = vsel %vm1676_vm11, %v1645_v20, %v1362_v19 }
 0x231   : > { %2246 = vmatmul.msk.f32.gmra.mxu0 %vm1718_vm12, %v1678_v15 }
 0x232   : > { %1307 = vrot.lane.b32.xlu2 %v4952_v6, %s2489_s23 }
 0x233   : > { %1383 = vrot.lane.b32.xlu1 %v4953_v29, %s2488_s22 }
 0x234   : > { %1371 = vrot.lane.b32.xlu0 %v4954_v51, %s2488_s22  ;;  %v1378_v46 = vpop.permute.xlu2 %1377  ;;  %v4960_v51 = vld [vmem:[#allocation127_spill] sm:$0xff] }
 0x235   : > { %v1274_v56 = vpop.permute.xlu1 %1273 }
 0x236   : > { %v1196_v44 = vpop.permute.xlu0 %1195  ;;  %v1646_v25 = vsel %vm1643_vm10, %v1613_v5, %v1274_v56  ;;  %v1515_v56 = vsel %vm1511_vm5, %v1482_v18, %v4960_v51  ;;  %v4963_v18 = vld [vmem:[#allocation21_spill] sm:$0xff]  ;;  %v4972_v51 = vld [vmem:[#allocation96_spill] sm:$0xff] }
 0x237   : > { %v1619_v55 = vsel %vm1610_vm9, %v3740_v62, %v1196_v44 }
 0x238   : > { %v1652_v19 = vsel %vm1643_vm10, %v1619_v55, %v1286_v48 }
 0x23a   : > { %1409 = vrot.lane.b32.xlu2 %v4956_v10, %s2488_s22 }
 0x23b   : > { %1397 = vrot.lane.b32.xlu1 %v4958_v28, %s2488_s22 }
 0x23c   : > { %1319 = vrot.lane.b32.xlu0 %v4959_v41, %s2489_s23  ;;  %v1188_v4 = vpop.permute.xlu2 %1187 }
 0x23d   : > { %v1376_v62 = vpop.permute.xlu1 %1375 }
 0x23e   : > { %v1364_v0 = vpop.permute.xlu0 %1363  ;;  %v1685_v20 = vsel %vm1676_vm11, %v1652_v19, %v1376_v62  ;;  %v4967_v19 = vld [vmem:[#allocation77_spill] sm:$0xff] }
 0x23f   : > { %v1679_v15 = vsel %vm1676_vm11, %v1646_v25, %v1364_v0  ;;  %2253 = vmatmul.msk.f32.vlgmr.msra.gmra.mxu1 %vm1718_vm12, %v1685_v20  ;;  %v4968_v25 = vld [vmem:[#allocation49_spill] sm:$0xff] }
 0x240   : > { %2247 = vmatmul.msk.f32.gmra.mxu0 %vm1718_vm12, %v1679_v15  ;;  %v4969_v0 = vld [vmem:[#allocation37_spill] sm:$0xff] }
 0x242   : > { %1135 = vrot.lane.b32.xlu2 %v4931_v27, %s2486_s20  ;;  %v4961_v27 = vld [vmem:[#allocation51_spill] sm:$0xff] }
 0x243   : > { %1205 = vrot.lane.b32.xlu1 %v4911_v34, %s2487_s21  ;;  %v1548_v40 = vsel %vm1544_vm6, %v1515_v56, %v4961_v27  ;;  %v4973_v27 = vld [vmem:[#allocation126_spill] sm:$0xff] }
 0x244   : > { %1193 = vrot.lane.b32.xlu0 %v2656_v47, %s2487_s21  ;;  %v1290_v38 = vpop.permute.xlu2 %1289  ;;  %v1581_v47 = vsel %vm1577_vm7, %v1548_v40, %v3671_v42  ;;  %v4964_v42 = vld [vmem:[#allocation68_spill] sm:$0xff] }
 0x245   : > { %v1276_v59 = vpop.permute.xlu1 %1275  ;;  %v1614_v34 = vsel %vm1610_vm9, %v1581_v47, %v3940_v7  ;;  %v4966_v7 = vld [vmem:[#allocation47_spill] sm:$0xff] }
 0x246   : > { %v1198_v48 = vpop.permute.xlu0 %1197 }
 0x247   : > { %v1620_v6 = vsel %vm1610_vm9, %v3737_v12, %v1198_v48  ;;  %v4962_v12 = vld [vmem:[#allocation30_spill] sm:$0xff] }
 0x248   : > { %v1653_v29 = vsel %vm1643_vm10, %v1620_v6, %v1288_v3  ;;  %v4971_v48 = vld [vmem:[#allocation10_spill] sm:$0xff] }
 0x249   : > { %v1686_v44 = vsel %vm1676_vm11, %v1653_v29, %v1378_v46  ;;  %v1647_v46 = vsel %vm1643_vm10, %v1614_v34, %v1276_v59 }
 0x24a   : > { %2254 = vmatmul.msk.f32.gmra.mxu1 %vm1718_vm12, %v1686_v44  ;;  %1219 = vrot.lane.b32.xlu2 %v4927_v58, %s2487_s21  ;;  %v4965_v58 = vld [vmem:[#allocation59_spill] sm:$0xff] }
 0x24b   : > { %1295 = vrot.lane.b32.xlu1 %v4962_v12, %s2489_s23  ;;  %v4974_v12 = vld [vmem:[#allocation151_spill] sm:$0xff] }
 0x24c   : > { %1283 = vrot.lane.b32.xlu0 %v4963_v18, %s2489_s23  ;;  %v1380_v3 = vpop.permute.xlu2 %1379  ;;  %v4975_v18 = vld [vmem:[#allocation88_spill] sm:$0xff] }
 0x24d   : > { %v1366_v31 = vpop.permute.xlu1 %1365 }
 0x24e   : > { %v1212_v55 = vpop.permute.xlu0 %1211  ;;  %v1680_v21 = vsel %vm1676_vm11, %v1647_v46, %v1366_v31 }
 0x24f   : > { %2248 = vmatmul.msk.f32.gmra.mxu0 %vm1718_vm12, %v1680_v21  ;;  %v1627_v8 = vsel %vm1610_vm9, %v3696_v22, %v1212_v55  ;;  %v4970_v22 = vld [vmem:[#allocation64_spill] sm:$0xff] }
 0x250   : > { %v1452_v6 = vsel %vm1449_vm3, %v4971_v48, %v4970_v22  ;;  %v4983_v22 = vld [vmem:[#allocation48_spill] sm:$0xff] }
 0x251   : > { %v1483_v56 = vsel %vm1480_vm4, %v1452_v6, %v4972_v51  ;;  %v4985_v6 = vld [vmem:[#allocation36_spill] sm:$0xff]  ;;  %v4986_v51 = vld [vmem:[#allocation67_spill] sm:$0xff] }
 0x252   : > { %1385 = vrot.lane.b32.xlu2 %v4964_v42, %s2488_s22  ;;  %v1516_v40 = vsel %vm1511_vm5, %v1483_v56, %v4973_v27 }
 0x253   : > { %1373 = vrot.lane.b32.xlu1 %v4965_v58, %s2488_s22  ;;  %v1549_v34 = vsel %vm1544_vm6, %v1516_v40, %v4974_v12 }
 0x254   : > { %1231 = vrot.lane.b32.xlu0 %v4966_v7, %s2487_s21  ;;  %v1190_v26 = vpop.permute.xlu2 %1189 }
 0x255   : > { %v1392_v28 = vpop.permute.xlu1 %1391 }
 0x256   : > { %v1302_v41 = vpop.permute.xlu0 %1301 }
 0x257   : > { %v1660_v5 = vsel %vm1643_vm10, %v1627_v8, %v1302_v41  ;;  %v4979_v41 = vld [vmem:[#allocation70_spill] sm:$0xff] }
 0x258   : > { %v1693_v62 = vsel %vm1676_vm11, %v1660_v5, %v1392_v28  ;;  %v4980_v5 = vld [vmem:[#allocation11_spill] sm:$0xff] }
 0x259   : > { %2261 = vmatmul.msk.f32.vlgmr.msra.gmra.mxu2 %vm1718_vm12, %v1693_v62  ;;  %v1453_v62 = vsel %vm1449_vm3, %v4980_v5, %v4979_v41  ;;  %v4993_v41 = vld [vmem:[#allocation115_spill] sm:$0xff]  ;;  %v4994_v5 = vld [vmem:[#allocation66_spill] sm:$0xff] }
 0x25a   : > { %1399 = vrot.lane.b32.xlu2 %v4967_v19, %s2488_s22 }
 0x25b   : > { %1321 = vrot.lane.b32.xlu1 %v4968_v25, %s2489_s23  ;;  %v4981_v25 = vld [vmem:[#allocation106_spill] sm:$0xff] }
 0x25c   : > { %1309 = vrot.lane.b32.xlu0 %v4969_v0, %s2489_s23  ;;  %v1292_v20 = vpop.permute.xlu2 %1291  ;;  %v1484_v0 = vsel %vm1480_vm4, %v1453_v62, %v4981_v25 }
 0x25d   : > { %v1278_v15 = vpop.permute.xlu1 %1277 }
 0x25e   : > { %v1200_v59 = vpop.permute.xlu0 %1199 }
 0x25f   : > { %v1621_v29 = vsel %vm1610_vm9, %v3653_v13, %v1200_v59  ;;  %v1582_v13 = vsel %vm1577_vm7, %v1549_v34, %v3609_v50  ;;  %v4977_v50 = vld [vmem:[#allocation33_spill] sm:$0xff]  ;;  %v4988_v34 = vld [vmem:[#allocation76_spill] sm:$0xff] }
 0x260   : > { %v1654_v44 = vsel %vm1643_vm10, %v1621_v29, %v1290_v38  ;;  %v1615_v38 = vsel %vm1610_vm9, %v1582_v13, %v1188_v4 }
 0x261   : > { %v1687_v47 = vsel %vm1676_vm11, %v1654_v44, %v1380_v3  ;;  %v1648_v46 = vsel %vm1643_vm10, %v1615_v38, %v1278_v15  ;;  %v4982_v15 = vld [vmem:[#allocation15_spill] sm:$0xff] }
 0x262   : > { %2255 = vmatmul.msk.f32.gmra.mxu1 %vm1718_vm12, %v1687_v47  ;;  %1137 = vrot.lane.b32.xlu2 %v4956_v10, %s2486_s20  ;;  %v4976_v10 = vld [vmem:[#allocation45_spill] sm:$0xff]  ;;  %v1517_v59 = vsel %vm1511_vm5, %v1484_v0, %v4982_v15 }
 0x263   : > { %1207 = vrot.lane.b32.xlu1 %v4908_v45, %s2487_s21  ;;  %v4978_v45 = vld [vmem:[#allocation28_spill] sm:$0xff] }
 0x264   : > { %1411 = vrot.lane.b32.xlu0 %v4975_v18, %s2488_s22  ;;  %v1370_v3 = vpop.permute.xlu2 %1369 }
 0x265   : > { %v1368_v31 = vpop.permute.xlu1 %1367 }
 0x266   : > { %v1214_v55 = vpop.permute.xlu0 %1213  ;;  %v1681_v21 = vsel %vm1676_vm11, %v1648_v46, %v1368_v31  ;;  %v4989_v46 = vld [vmem:[#allocation42_spill] sm:$0xff]  ;;  %v4990_v31 = vld [vmem:[#allocation27_spill] sm:$0xff] }
 0x267   : > { %2249 = vmatmul.msk.f32.gmra.mxu0 %vm1718_vm12, %v1681_v21  ;;  %v1628_v58 = vsel %vm1610_vm9, %v3861_v49, %v1214_v55  ;;  %v4984_v49 = vld [vmem:[#allocation150_spill] sm:$0xff] }
 0x268   : > { %v1550_v48 = vsel %vm1544_vm6, %v1517_v59, %v4984_v49 }
 0x269   : > { %v1583_v29 = vsel %vm1577_vm7, %v1550_v48, %v3698_v52  ;;  %v4987_v52 = vld [vmem:[#allocation87_spill] sm:$0xff] }
 0x26a   : > { %1233 = vrot.lane.b32.xlu2 %v4976_v10, %s2487_s21  ;;  %v1616_v44 = vsel %vm1610_vm9, %v1583_v29, %v1190_v26  ;;  %v4997_v29 = vld [vmem:[#allocation40_spill] sm:$0xff] }
 0x26b   : > { %1221 = vrot.lane.b32.xlu1 %v4977_v50, %s2487_s21 }
 0x26c   : > { %1297 = vrot.lane.b32.xlu0 %v4978_v45, %s2489_s23  ;;  %v1318_v4 = vpop.permute.xlu2 %1317 }
 0x26d   : > { %v1394_v42 = vpop.permute.xlu1 %1393 }
 0x26e   : > { %v1304_v28 = vpop.permute.xlu0 %1303 }
 0x26f   : > { %v1661_v8 = vsel %vm1643_vm10, %v1628_v58, %v1304_v28  ;;  %v4992_v28 = vld [vmem:[#allocation114_spill] sm:$0xff] }
 0x270   : > { %v1694_v19 = vsel %vm1676_vm11, %v1661_v8, %v1394_v42  ;;  %v1079_v8 = vrot.slane %v4992_v28, 2 }
 0x271   : > { %2262 = vmatmul.msk.f32.gmra.mxu2 %vm1718_vm12, %v1694_v19 }
 0x272   : > { %1323 = vrot.lane.b32.xlu2 %v4983_v22, %s2489_s23 }
 0x273   : > { %1311 = vrot.lane.b32.xlu1 %v4985_v6, %s2489_s23 }
 0x274   : > { %1387 = vrot.lane.b32.xlu0 %v4986_v51, %s2488_s22  ;;  %v4098_v56 = vpop.permute.xlu2 %1191 }
 0x275   : > { %v1280_v27 = vpop.permute.xlu1 %1279 }
 0x276   : > { %v1649_v40 = vsel %vm1643_vm10, %v1616_v44, %v1280_v27  ;;  %v1202_v47 = vpop.permute.xlu0 %1201 }
 0x277   : > { %v1682_v12 = vsel %vm1676_vm11, %v1649_v40, %v1370_v3  ;;  %v1622_v3 = vsel %vm1610_vm9, %v3782_v54, %v1202_v47  ;;  %v4991_v54 = vld [vmem:[#allocation46_spill] sm:$0xff]  ;;  %v4999_v47 = vld [vmem:[#allocation9_spill] sm:$0xff] }
 0x278   : > { %2250 = vmatmul.msk.f32.gmra.mxu0 %vm1718_vm12, %v1682_v12  ;;  %v1655_v45 = vsel %vm1643_vm10, %v1622_v3, %v1292_v20  ;;  %v4998_v40 = vld [vmem:[#allocation54_spill] sm:$0xff] }
 0x279   : > { %v1454_v12 = vsel %vm1449_vm3, %v4999_v47, %v4998_v40 }
 0x27a   : > { %1209 = vrot.lane.b32.xlu2 %v2765_v61, %s2487_s21 }
 0x27b   : > { %1413 = vrot.lane.b32.xlu1 %v4987_v52, %s2488_s22 }
 0x27c   : > { %1401 = vrot.lane.b32.xlu0 %v4988_v34, %s2488_s22  ;;  %v1282_v13 = vpop.permute.xlu2 %1281  ;;  %v5000_v34 = vld [vmem:[#allocation105_spill] sm:$0xff] }
 0x27d   : > { %v1228_v38 = vpop.permute.xlu1 %1227 }
 0x27e   : > { %v1216_v26 = vpop.permute.xlu0 %1215  ;;  %v1635_v58 = vsel %vm1610_vm9, %v3920_v32, %v1228_v38  ;;  %v1485_v38 = vsel %vm1480_vm4, %v1454_v12, %v5000_v34 }
 0x27f   : > { %v1629_v62 = vsel %vm1610_vm9, %v3858_v23, %v1216_v26  ;;  %v1668_v32 = vsel %vm1643_vm10, %v1635_v58, %v1318_v4  ;;  %v4995_v23 = vld [vmem:[#allocation83_spill] sm:$0xff]  ;;  %v4996_v4 = vld [vmem:[#allocation134_spill] sm:$0xff]  ;;  %v5001_v26 = vld [vmem:[#allocation128_spill] sm:$0xff] }
 0x280   : > { %v1518_v3 = vsel %vm1511_vm5, %v1485_v38, %v5001_v26 }
 0x282   : > { %1223 = vrot.lane.b32.xlu2 %v4989_v46, %s2487_s21 }
 0x283   : > { %1299 = vrot.lane.b32.xlu1 %v4990_v31, %s2489_s23 }
 0x284   : > { %1139 = vrot.lane.b32.xlu0 %v4975_v18, %s2486_s20  ;;  %v4118_v61 = vpop.permute.xlu2 %1229  ;;  %v1078_v18 = vrot.slane %v4993_v41, 2 }
 0x285   : > { %v1306_v55 = vpop.permute.xlu1 %1305 }
 0x286   : > { %v1382_v21 = vpop.permute.xlu0 %1381  ;;  %v1662_v25 = vsel %vm1643_vm10, %v1629_v62, %v1306_v55  ;;  %v1080_v22 = vsel %vm713_vm2, %v1078_v18, %v1079_v8  ;;  %v5003_v55 = vld [vmem:[#allocation138_spill] sm:$0xff] }
 0x287   : > { %v1688_v42 = vsel %vm1676_vm11, %v1655_v45, %v1382_v21  ;;  %v4175_v21 = vld [vmem:[%s4560_s2] ss:$0 sm:$0xff]  ;;  %v5004_v45 = vld [vmem:[#allocation135_spill] sm:$0xff] }
 0x288   : > { %2256 = vmatmul.msk.f32.gmra.mxu1 %vm1718_vm12, %v1688_v42  ;;  %v1081_v42 = vrot.slane %v5004_v45, 2 }
 0x28a   : > { %1313 = vrot.lane.b32.xlu2 %v4991_v54, %s2489_s23  ;;  %v5005_v54 = vld [vmem:[#allocation44_spill] sm:$0xff] }
 0x28b   : > { %1389 = vrot.lane.b32.xlu1 %v4994_v5, %s2488_s22 }
 0x28c   : > { %1235 = vrot.lane.b32.xlu0 %v4993_v41, %s2487_s21  ;;  %v1308_v20 = vpop.permute.xlu2 %1307 }
 0x28d   : > { %v1408_v19 = vpop.permute.xlu1 %1407 }
 0x28e   : > { %v1396_v0 = vpop.permute.xlu0 %1395  ;;  %v1701_v15 = vsel %vm1676_vm11, %v1668_v32, %v1408_v19 }
 0x28f   : > { %v1695_v59 = vsel %vm1676_vm11, %v1662_v25, %v1396_v0  ;;  %2269 = vmatmul.msk.f32.vlgmr.msra.gmra.mxu3 %vm1718_vm12, %v1701_v15  ;;  %v5006_v25 = vld [vmem:[#allocation84_spill] sm:$0xff] }
 0x290   : > { %2263 = vmatmul.msk.f32.gmra.mxu2 %vm1718_vm12, %v1695_v59  ;;  %v5007_v15 = vld [vmem:[#allocation108_spill] sm:$0xff] }
 0x292   : > { %1415 = vrot.lane.b32.xlu2 %v1080_v22, %s2488_s22 }
 0x293   : > { %1403 = vrot.lane.b32.xlu1 %v4995_v23, %s2488_s22  ;;  %v5008_v23 = vld [vmem:[#allocation141_spill] sm:$0xff] }
 0x294   : > { %1325 = vrot.lane.b32.xlu0 %v4996_v4, %s2489_s23  ;;  %v1410_v49 = vpop.permute.xlu2 %1409 }
 0x295   : > { %v1134_v48 = vpop.permute.xlu1 %1133 }
 0x296   : > { %v1204_v6 = vpop.permute.xlu0 %1203 }
 0x29a   : > { %1237 = vrot.lane.b32.xlu2 %v4992_v28, %s2487_s21 }
 0x29b   : > { %1225 = vrot.lane.b32.xlu1 %v4997_v29, %s2487_s21  ;;  %s2241_s21 = sshll.u32 %s4159_s29, 8 }
 0x29c   : > { %1141 = vrot.lane.b32.xlu0 %v4987_v52, %s2486_s20  ;;  %v4153_v44 = vpop.permute.xlu2 %1135  ;;  %v5002_v52 = vld [vmem:[#allocation53_spill] sm:$0xff] }
 0x29d   : > { %v1218_v51 = vpop.permute.xlu1 %1217  ;;  %v1551_v31 = vsel %vm1544_vm6, %v1518_v3, %v5002_v52 }
 0x29e   : > { %v1294_v27 = vpop.permute.xlu0 %1293  ;;  %v1584_v58 = vsel %vm1577_vm7, %v1551_v31, %v3693_v17  ;;  %v1473_v17 = vsel %vm1449_vm3, %v4977_v50, %v5006_v25 }
 0x29f   : > { %v1617_v28 = vsel %vm1610_vm9, %v1584_v58, %v4098_v56  ;;  %v1082_v56 = vsel %vm713_vm2, %v1079_v8, %v1081_v42  ;;  %v1504_v59 = vsel %vm1480_vm4, %v1473_v17, %v5007_v15 }
 0x2a0   : > { %v1650_v5 = vsel %vm1643_vm10, %v1617_v28, %v1282_v13  ;;  %v1537_v4 = vsel %vm1511_vm5, %v1504_v59, %v5008_v23 }
 0x2a1   : > { %v1570_v50 = vsel %vm1544_vm6, %v1537_v4, %v3613_v43 }
 0x2a2   : > { %1405 = vrot.lane.b32.xlu2 %v4942_v53, %s2488_s22  ;;  %v1623_v53 = vsel %vm1610_vm9, %v3779_v39, %v1204_v6  ;;  %v1630_v6 = vsel %vm1610_vm9, %v3732_v37, %v1218_v51  ;;  %v1603_v8 = vsel %vm1577_vm7, %v1570_v50, %v1134_v48 }
 0x2a3   : > { %1327 = vrot.lane.b32.xlu1 %v5003_v55, %s2489_s23  ;;  %v1656_v41 = vsel %vm1643_vm10, %v1623_v53, %v1294_v27  ;;  %v1663_v40 = vsel %vm1643_vm10, %v1630_v6, %v1308_v20  ;;  %v1636_v12 = vsel %vm1610_vm9, %v1603_v8, %v4118_v61 }
 0x2a4   : > { %1315 = vrot.lane.b32.xlu0 %v5005_v54, %s2489_s23  ;;  %v1220_v13 = vpop.permute.xlu2 %1219  ;;  %s4201_s23 = scalar_lea.vmem [#allocation2], %s2241_s21 }
 0x2a5   : > { %v1384_v18 = vpop.permute.xlu1 %1383  ;;  %s2093_s14 = sshll.u32 %s4201_s23, 4  ;;  %s2094_s14 = int_to_ptr.vmem [resolvable:$true] %s2093_s14 }
 0x2a6   : > { %v1836_v62 = vpop.f32.mrf.mxu0  ;;  %v1372_v19 = vpop.permute.xlu0 %1371  ;;  %v1689_v32 = vsel %vm1676_vm11, %v1656_v41, %v1384_v18 }
 0x2a7   : > { %v1837_v39 = vadd.f32 %v4175_v21, %v1836_v62  ;;  %v1683_v0 = vsel %vm1676_vm11, %v1650_v5, %v1372_v19  ;;  %2257 = vmatmul.msk.f32.gmra.mxu1 %vm1718_vm12, %v1689_v32 }
 0x2a8   : > { %2251 = vmatmul.msk.f32.gmra.mxu0 %vm1718_vm12, %v1683_v0 }
 0x2a9   : > { %1932 = vst [vmem:[%s4201_s23] sm:$0xff] %v1837_v39  ;;  %v2002_v48 = vmul.f32 %v1837_v39, %v1837_v39 }
 0x2aa   : > { %1145 = vrot.lane.b32.xlu2 %v1082_v56, %s2486_s20 }
 0x2ab   : > { %1143 = vrot.lane.b32.xlu1 %v1080_v22, %s2486_s20  ;;  %s2283_s20 = sshll.u32 %s2552_s26, 8 }
 0x2ac   : > { %1417 = vrot.lane.b32.xlu0 %v1082_v56, %s2488_s22  ;;  %v1386_v61 = vpop.permute.xlu2 %1385  ;;  %s2092_s13 = scalar_lea.hbm %s4563_s5, %s2283_s20 }
 0x2ad   : > { %v1398_v27 = vpop.permute.xlu1 %1397  ;;  %s2095_s15 = sshll.u32 %s2092_s13, 4  ;;  %s2096_s15 = int_to_ptr.hbm [resolvable:$true] %s2095_s15 }
 0x2ae   : > { %v1839_v47 = vpop.f32.mrf.mxu0  ;;  %v1320_v43 = vpop.permute.xlu0 %1319  ;;  %v1696_v34 = vsel %vm1676_vm11, %v1663_v40, %v1398_v27  ;;  %v5009_v27 = vld [vmem:[#allocation100_spill] sm:$0xff]  ;;  %s2372_s18 = sshra.s32 %s2096_s15, 4  ;;  %s2373_s18 = int_to_ptr.hbm [resolvable:$true] %s2372_s18 }
 0x2af   : > { %v1840_v37 = vadd.f32 %v4175_v21, %v1839_v47  ;;  %v1669_v51 = vsel %vm1643_vm10, %v1636_v12, %v1320_v43  ;;  %2264 = vmatmul.msk.f32.gmra.mxu2 %vm1718_vm12, %v1696_v34  ;;  %v1474_v40 = vsel %vm1449_vm3, %v4989_v46, %v5009_v27  ;;  %v5010_v12 = vld [vmem:[#allocation122_spill] sm:$0xff]  ;;  %s2374_s19 = scalar_lea.hbm %s2373_s18, 256  ;;  %p2379_p0 = scmp.lt.s32.totalorder %s2373_s18, %s4563_s5 }
 0x2b0   : > { %v1702_v22 = vsel %vm1676_vm11, %v1669_v51, %v1410_v49  ;;  %v1505_v43 = vsel %vm1480_vm4, %v1474_v40, %v5010_v12  ;;  %p2375_p11 = scmp.ne.s32.totalorder %s2373_s18, %s2374_s19  ;;  %p2380_p1 = scmp.lt.s32.totalorder %s2378_s11, %s2374_s19 }
 0x2b1   : > { %1933 = vst [vmem:[%s4201_s23 + $0x8] sm:$0xff] %v1840_v37  ;;  %v1964_v38 = vadd.f32 %v1840_v37, %v1837_v39  ;;  %v2003_v20 = vmul.f32 %v1840_v37, %v1840_v37  ;;  %2270 = vmatmul.msk.f32.gmra.mxu3 %vm1718_vm12, %v1702_v22 }
 0x2b2   : > { %p2376_p12 = pnand %p2375_p11, %p2571_p5  ;;  %p2381_p2 = por %p2380_p1, %p2379_p0 }
 0x2b3   : > { %v2034_v26 = vadd.f32 %v2003_v20, %v2002_v48 }
 0x2b4   : > { %v1400_v31 = vpop.permute.xlu2 %1399  ;;  %p2377_p13 = pneg %p2376_p12 }
 0x2b5   : > { %v1206_v3 = vpop.permute.xlu1 %1205 }
 0x2b6   : > { %v1194_v52 = vpop.permute.xlu0 %1193  ;;  %v1624_v45 = vsel %vm1610_vm9, %v3674_v2, %v1206_v3  ;;  %p2382_p3 = pnand %p2381_p2, %p2377_p13 }
 0x2b7   : > { %v1618_v62 = vsel %vm1610_vm9, %v3632_v60, %v1194_v52  ;;  %v1631_v60 = vsel %vm1610_vm9, %v3893_v9, %v1220_v13  ;;  %v5011_v9 = vld [vmem:[#allocation132_spill] sm:$0xff] }
 0x2b8   : > { %v1538_v13 = vsel %vm1511_vm5, %v1505_v43, %v5011_v9 }
 0x2b9   : > { %v1571_v51 = vsel %vm1544_vm6, %v1538_v13, %v3611_v11 }
 0x2ba   : > { %v1604_v46 = vsel %vm1577_vm7, %v1571_v51, %v4153_v44 }
 0x2bc   : > { %v1860_v55 = vpop.f32.mrf.mxu1  ;;  %v1138_v39 = vpop.permute.xlu2 %1137 }
 0x2bd   : > { %v1842_v42 = vpop.f32.mrf.mxu0  ;;  %v4225_v49 = vadd.f32 %v4175_v21, %v1860_v55  ;;  %v1296_v58 = vpop.permute.xlu1 %1295 }
 0x2be   : > { %v1843_v53 = vadd.f32 %v4175_v21, %v1842_v42  ;;  %v1657_v54 = vsel %vm1643_vm10, %v1624_v45, %v1296_v58  ;;  %v1284_v28 = vpop.permute.xlu0 %1283 }
 0x2bf   : > { %1940 = vst [vmem:[%s4201_s23 + $0x40] sm:$0xff] %v4225_v49  ;;  %v1690_v41 = vsel %vm1676_vm11, %v1657_v54, %v1386_v61  ;;  %v1651_v19 = vsel %vm1643_vm10, %v1618_v62, %v1284_v28 }
 0x2c0   : > { %1934 = vst [vmem:[%s4201_s23 + $0x10] sm:$0xff] %v1843_v53  ;;  %v1965_v18 = vadd.f32 %v1964_v38, %v1843_v53  ;;  %v2004_v5 = vmul.f32 %v1843_v53, %v1843_v53  ;;  %2258 = vmatmul.msk.f32.gmra.mxu1 %vm1718_vm12, %v1690_v41 }
 0x2c2   : > { %v2035_v2 = vadd.f32 %v2034_v26, %v2004_v5 }
 0x2c4   : > { %v1234_v34 = vpop.permute.xlu2 %1233 }
 0x2c5   : > { %v1374_v32 = vpop.permute.xlu1 %1373 }
 0x2c6   : > { %v1232_v25 = vpop.permute.xlu0 %1231  ;;  %v1684_v17 = vsel %vm1676_vm11, %v1651_v19, %v1374_v32  ;;  %v5013_v32 = vld [vmem:[#allocation14_spill] sm:$0xff] }
 0x2c7   : > { %v1863_v0 = vpop.f32.mrf.mxu1  ;;  %2252 = vmatmul.msk.f32.gmra.mxu0 %vm1718_vm12, %v1684_v17  ;;  %v1637_v22 = vsel %vm1610_vm9, %v1604_v46, %v1232_v25 }
 0x2c8   : > { %v4240_v56 = vadd.f32 %v4175_v21, %v1863_v0 }
 0x2ca   : > { %1941 = vst [vmem:[%s4201_s23 + $0x48] sm:$0xff] %v4240_v56 }
 0x2cc   : > { %v1845_v15 = vpop.f32.mrf.mxu0  ;;  %v1324_v26 = vpop.permute.xlu2 %1323 }
 0x2cd   : > { %v1846_v59 = vadd.f32 %v4175_v21, %v1845_v15  ;;  %v1322_v23 = vpop.permute.xlu1 %1321  ;;  %v5015_v15 = vld [vmem:[#allocation152_spill] sm:$0xff] }
 0x2ce   : > { %v1310_v4 = vpop.permute.xlu0 %1309  ;;  %v1670_v38 = vsel %vm1643_vm10, %v1637_v22, %v1322_v23 }
 0x2cf   : > { %1935 = vst [vmem:[%s4201_s23 + $0x18] sm:$0xff] %v1846_v59  ;;  %v1966_v50 = vadd.f32 %v1965_v18, %v1846_v59  ;;  %v2005_v6 = vmul.f32 %v1846_v59, %v1846_v59  ;;  %v1664_v8 = vsel %vm1643_vm10, %v1631_v60, %v1310_v4  ;;  %v5012_v18 = vld [vmem:[#allocation99_spill] sm:$0xff] }
 0x2d0   : > { %v1697_v47 = vsel %vm1676_vm11, %v1664_v8, %v1400_v31  ;;  %v1475_v5 = vsel %vm1449_vm3, %v4997_v29, %v5012_v18 }
 0x2d1   : > { %v2036_v37 = vadd.f32 %v2035_v2, %v2005_v6  ;;  %2265 = vmatmul.msk.f32.gmra.mxu2 %vm1718_vm12, %v1697_v47  ;;  %v1506_v25 = vsel %vm1480_vm4, %v1475_v5, %v5013_v32 }
 0x2d4   : > { %v1210_v58 = vpop.permute.xlu2 %1209 }
 0x2d5   : > { %v1208_v48 = vpop.permute.xlu1 %1207  ;;  %v1626_v22 = vsel %vm1610_vm9, %v3823_v24, %v1210_v58 }
 0x2d6   : > { %v1412_v20 = vpop.permute.xlu0 %1411  ;;  %v1625_v42 = vsel %vm1610_vm9, %v3826_v1, %v1208_v48  ;;  %v5014_v1 = vld [vmem:[#allocation144_spill] sm:$0xff] }
 0x2d7   : > { %v1703_v61 = vsel %vm1676_vm11, %v1670_v38, %v1412_v20  ;;  %v1539_v17 = vsel %vm1511_vm5, %v1506_v25, %v5014_v1 }
 0x2d8   : > { %2271 = vmatmul.msk.f32.gmra.mxu3 %vm1718_vm12, %v1703_v61  ;;  %v1572_v59 = vsel %vm1544_vm6, %v1539_v17, %v5015_v15 }
 0x2d9   : > { %v1605_v23 = vsel %vm1577_vm7, %v1572_v59, %v1138_v39  ;;  %v5019_v59 = vld [vmem:[#allocation102_spill] sm:$0xff] }
 0x2da   : > { %v1638_v29 = vsel %vm1610_vm9, %v1605_v23, %v1234_v34  ;;  %v1477_v23 = vsel %vm1449_vm3, %v4947_v16, %v5019_v59 }
 0x2db   : > { %v1671_v60 = vsel %vm1643_vm10, %v1638_v29, %v1324_v26  ;;  %v5016_v26 = vld [vmem:[#allocation90_spill] sm:$0xff] }
 0x2dc   : > { %v1884_v3 = vpop.f32.mrf.mxu2  ;;  %v1224_v40 = vpop.permute.xlu2 %1223 }
 0x2dd   : > { %v4267_v52 = vadd.f32 %v4175_v21, %v1884_v3  ;;  %v1222_v11 = vpop.permute.xlu1 %1221  ;;  %v1476_v3 = vsel %vm1449_vm3, %v4913_v35, %v5016_v26  ;;  %v1633_v58 = vsel %vm1610_vm9, %v3774_v33, %v1224_v40 }
 0x2de   : > { %v1298_v31 = vpop.permute.xlu0 %1297  ;;  %v1632_v4 = vsel %vm1610_vm9, %v3890_v30, %v1222_v11  ;;  %v5017_v11 = vld [vmem:[#allocation111_spill] sm:$0xff] }
 0x2df   : > { %1948 = vst [vmem:[%s4201_s23 + $0x80] sm:$0xff] %v4267_v52  ;;  %v1866_v44 = vpop.f32.mrf.mxu1  ;;  %v1658_v28 = vsel %vm1643_vm10, %v1625_v42, %v1298_v31  ;;  %v1507_v31 = vsel %vm1480_vm4, %v1476_v3, %v5017_v11 }
 0x2e0   : > { %v4272_v55 = vadd.f32 %v4175_v21, %v1866_v44  ;;  %v5018_v44 = vld [vmem:[#allocation143_spill] sm:$0xff] }
 0x2e2   : > { %1942 = vst [vmem:[%s4201_s23 + $0x50] sm:$0xff] %v4272_v55 }
 0x2e4   : > { %v1848_v45 = vpop.f32.mrf.mxu0  ;;  %v1314_v51 = vpop.permute.xlu2 %1313 }
 0x2e5   : > { %v1849_v53 = vadd.f32 %v4175_v21, %v1848_v45  ;;  %v1312_v54 = vpop.permute.xlu1 %1311  ;;  %v1540_v45 = vsel %vm1511_vm5, %v1507_v31, %v5018_v44 }
 0x2e6   : > { %v1388_v41 = vpop.permute.xlu0 %1387  ;;  %v1665_v6 = vsel %vm1643_vm10, %v1632_v4, %v1312_v54  ;;  %v1573_v42 = vsel %vm1544_vm6, %v1540_v45, %v3634_v36  ;;  %v5020_v4 = vld [vmem:[#allocation124_spill] sm:$0xff] }
 0x2e7   : > { %1936 = vst [vmem:[%s4201_s23 + $0x20] sm:$0xff] %v1849_v53  ;;  %v1967_v2 = vadd.f32 %v1966_v50, %v1849_v53  ;;  %v2006_v62 = vmul.f32 %v1849_v53, %v1849_v53  ;;  %v1691_v19 = vsel %vm1676_vm11, %v1658_v28, %v1388_v41  ;;  %v1666_v53 = vsel %vm1643_vm10, %v1633_v58, %v1314_v51  ;;  %v5025_v51 = vld [vmem:[#allocation153_spill] sm:$0xff] }
 0x2e8   : > { %2259 = vmatmul.msk.f32.gmra.mxu1 %vm1718_vm12, %v1691_v19 }
 0x2e9   : > { %v2037_v0 = vadd.f32 %v2036_v37, %v2006_v62 }
 0x2ec   : > { %v1416_v24 = vpop.permute.xlu2 %1415 }
 0x2ed   : > { %v1414_v50 = vpop.permute.xlu1 %1413 }
 0x2ee   : > { %v1402_v8 = vpop.permute.xlu0 %1401  ;;  %v1704_v27 = vsel %vm1676_vm11, %v1671_v60, %v1414_v50  ;;  %v1508_v50 = vsel %vm1480_vm4, %v1477_v23, %v5020_v4  ;;  %v2010_v4 = vmul.f32 %v4225_v49, %v4225_v49 }
 0x2ef   : > { %v1698_v47 = vsel %vm1676_vm11, %v1665_v6, %v1402_v8  ;;  %2272 = vmatmul.msk.f32.gmra.mxu3 %vm1718_vm12, %v1704_v27  ;;  %v5021_v27 = vld [vmem:[#allocation136_spill] sm:$0xff] }
 0x2f0   : > { %2266 = vmatmul.msk.f32.gmra.mxu2 %vm1718_vm12, %v1698_v47  ;;  %v1541_v40 = vsel %vm1511_vm5, %v1508_v50, %v5021_v27 }
 0x2f1   : > { %v1574_v16 = vsel %vm1544_vm6, %v1541_v40, %v3629_v14 }
 0x2f4   : > { %v1887_v39 = vpop.f32.mrf.mxu2  ;;  %v1238_v62 = vpop.permute.xlu2 %1237 }
 0x2f5   : > { %v4303_v12 = vadd.f32 %v4175_v21, %v1887_v39  ;;  %v1300_v43 = vpop.permute.xlu1 %1299  ;;  %v1851_v30 = vpop.f32.mrf.mxu0 }
 0x2f6   : > { %v1852_v34 = vadd.f32 %v4175_v21, %v1851_v30  ;;  %v1140_v37 = vpop.permute.xlu0 %1139  ;;  %v1659_v48 = vsel %vm1643_vm10, %v1626_v22, %v1300_v43  ;;  %v5023_v30 = vld [vmem:[#allocation123_spill] sm:$0xff] }
 0x2f7   : > { %1949 = vst [vmem:[%s4201_s23 + $0x88] sm:$0xff] %v4303_v12  ;;  %v1606_v54 = vsel %vm1577_vm7, %v1573_v42, %v1140_v37  ;;  %v5024_v37 = vld [vmem:[#allocation146_spill] sm:$0xff]  ;;  %v5026_v42 = vld [vmem:[#allocation93_spill] sm:$0xff] }
 0x2f8   : > { %1937 = vst [vmem:[%s4201_s23 + $0x28] sm:$0xff] %v1852_v34  ;;  %v4309_v9 = vadd.f32 %v1967_v2, %v1852_v34  ;;  %v2007_v13 = vmul.f32 %v1852_v34, %v1852_v34  ;;  %v1479_v58 = vsel %vm1449_vm3, %v4976_v10, %v5026_v42 }
 0x2fa   : > { %v4311_v46 = vadd.f32 %v2037_v0, %v2007_v13 }
 0x2fc   : > { %v1406_v6 = vpop.permute.xlu2 %1405 }
 0x2fd   : > { %v1390_v38 = vpop.permute.xlu1 %1389 }
 0x2fe   : > { %v1236_v20 = vpop.permute.xlu0 %1235  ;;  %v1692_v61 = vsel %vm1676_vm11, %v1659_v48, %v1390_v38 }
 0x2ff   : > { %2260 = vmatmul.msk.f32.gmra.mxu1 %vm1718_vm12, %v1692_v61  ;;  %v1639_v41 = vsel %vm1610_vm9, %v1606_v54, %v1236_v20  ;;  %v5027_v54 = vld [vmem:[#allocation116_spill] sm:$0xff] }
 0x305   : > { %v1869_v28 = vpop.f32.mrf.mxu1  ;;  %v1404_v35 = vpop.permute.xlu1 %1403 }
 0x306   : > { %v4333_v18 = vadd.f32 %v4175_v21, %v1869_v28  ;;  %v1326_v5 = vpop.permute.xlu0 %1325  ;;  %v1699_v2 = vsel %vm1676_vm11, %v1666_v53, %v1404_v35  ;;  %v1510_v28 = vsel %vm1480_vm4, %v1479_v58, %v5027_v54  ;;  %v1146_v35 = vpop.permute.xlu2 %1145 }
 0x307   : > { %v1672_v36 = vsel %vm1643_vm10, %v1639_v41, %v1326_v5  ;;  %2267 = vmatmul.msk.f32.gmra.mxu2 %vm1718_vm12, %v1699_v2 }
 0x308   : > { %1943 = vst [vmem:[%s4201_s23 + $0x58] sm:$0xff] %v4333_v18  ;;  %v1705_v33 = vsel %vm1676_vm11, %v1672_v36, %v1416_v24 }
 0x309   : > { %2273 = vmatmul.msk.f32.gmra.mxu3 %vm1718_vm12, %v1705_v33 }
 0x30d   : > { %v1226_v19 = vpop.permute.xlu1 %1225 }
 0x30e   : > { %v1142_v32 = vpop.permute.xlu0 %1141  ;;  %v1634_v29 = vsel %vm1610_vm9, %v3923_v63, %v1226_v19  ;;  %v5022_v63 = vld [vmem:[#allocation101_spill] sm:$0xff] }
 0x30f   : > { %v1478_v39 = vsel %vm1449_vm3, %v4966_v7, %v5022_v63  ;;  %v1607_v43 = vsel %vm1577_vm7, %v1574_v16, %v1142_v32 }
 0x310   : > { %v1509_v34 = vsel %vm1480_vm4, %v1478_v39, %v5023_v30  ;;  %v1640_v48 = vsel %vm1610_vm9, %v1607_v43, %v1238_v62  ;;  %v2013_v39 = vmul.f32 %v4333_v18, %v4333_v18 }
 0x311   : > { %v1542_v13 = vsel %vm1511_vm5, %v1509_v34, %v5024_v37 }
 0x312   : > { %v1908_v25 = vpop.f32.mrf.mxu3  ;;  %v1575_v22 = vsel %vm1544_vm6, %v1542_v13, %v5025_v51 }
 0x313   : > { %v1890_v1 = vpop.f32.mrf.mxu2  ;;  %v4343_v17 = vadd.f32 %v4175_v21, %v1908_v25 }
 0x314   : > { %v4346_v0 = vadd.f32 %v4175_v21, %v1890_v1 }
 0x315   : > { %1956 = vst [vmem:[%s4201_s23 + $0xc0] sm:$0xff] %v4343_v17  ;;  %v1328_v15 = vpop.permute.xlu1 %1327 }
 0x316   : > { %1950 = vst [vmem:[%s4201_s23 + $0x90] sm:$0xff] %v4346_v0  ;;  %v1316_v60 = vpop.permute.xlu0 %1315  ;;  %v1673_v38 = vsel %vm1643_vm10, %v1640_v48, %v1328_v15 }
 0x317   : > { %v1667_v8 = vsel %vm1643_vm10, %v1634_v29, %v1316_v60 }
 0x318   : > { %v1700_v47 = vsel %vm1676_vm11, %v1667_v8, %v1406_v6  ;;  %v2011_v8 = vmul.f32 %v4240_v56, %v4240_v56 }
 0x319   : > { %2268 = vmatmul.msk.f32.gmra.mxu2 %vm1718_vm12, %v1700_v47  ;;  %v2012_v47 = vmul.f32 %v4272_v55, %v4272_v55 }
 0x31d   : > { %v1144_v14 = vpop.permute.xlu1 %1143 }
 0x31e   : > { %v1608_v61 = vsel %vm1577_vm7, %v1575_v22, %v1144_v14  ;;  %v1418_v7 = vpop.permute.xlu0 %1417 }
 0x31f   : > { %v1706_v26 = vsel %vm1676_vm11, %v1673_v38, %v1418_v7  ;;  %v1641_v3 = vsel %vm1610_vm9, %v1608_v61, %v1236_v20  ;;  %v5028_v20 = vld [vmem:[#allocation145_spill] sm:$0xff] }
 0x320   : > { %2274 = vmatmul.msk.f32.gmra.mxu3 %vm1718_vm12, %v1706_v26  ;;  %v1674_v31 = vsel %vm1643_vm10, %v1641_v3, %v1326_v5  ;;  %v1543_v5 = vsel %vm1511_vm5, %v1510_v28, %v5028_v20  ;;  %v2018_v28 = vmul.f32 %v4267_v52, %v4267_v52  ;;  %v2019_v20 = vmul.f32 %v4303_v12, %v4303_v12 }
 0x321   : > { %v1707_v41 = vsel %vm1676_vm11, %v1674_v31, %v1416_v24  ;;  %v1576_v10 = vsel %vm1544_vm6, %v1543_v5, %v3655_v57 }
 0x322   : > { %v1609_v33 = vsel %vm1577_vm7, %v1576_v10, %v1146_v35 }
 0x323   : > { %v1642_v24 = vsel %vm1610_vm9, %v1609_v33, %v1238_v62 }
 0x324   : > { %v1872_v11 = vpop.f32.mrf.mxu1  ;;  %v1675_v32 = vsel %vm1643_vm10, %v1642_v24, %v1328_v15 }
 0x325   : > { %v1854_v44 = vpop.f32.mrf.mxu0  ;;  %v1873_v45 = vadd.f32 %v4175_v21, %v1872_v11  ;;  %v1708_v25 = vsel %vm1676_vm11, %v1675_v32, %v1418_v7 }
 0x326   : > { %v1855_v53 = vadd.f32 %v4175_v21, %v1854_v44 }
 0x327   : > { %1944 = vst [vmem:[%s4201_s23 + $0x60] sm:$0xff] %v1873_v45  ;;  %v2014_v30 = vmul.f32 %v1873_v45, %v1873_v45 }
 0x328   : > { %1938 = vst [vmem:[%s4201_s23 + $0x30] sm:$0xff] %v1855_v53  ;;  %v1969_v2 = vadd.f32 %v4309_v9, %v1855_v53  ;;  %v2008_v36 = vmul.f32 %v1855_v53, %v1855_v53  ;;  %2275 = vmatmul.msk.f32.gmra.mxu3 %vm1718_vm12, %v1707_v41 }
 0x32a   : > { %v2039_v19 = vadd.f32 %v4311_v46, %v2008_v36  ;;  %v2020_v36 = vmul.f32 %v4346_v0, %v4346_v0 }
 0x330   : > { %2276 = vmatmul.msk.f32.gmra.mxu3 %vm1718_vm12, %v1708_v25 }
 0x332   : > { %v1893_v9 = vpop.f32.mrf.mxu2 }
 0x333   : > { %v4406_v1 = vadd.f32 %v4175_v21, %v1893_v9 }
 0x334   : > { %v1911_v59 = vpop.f32.mrf.mxu3 }
 0x335   : > { %1951 = vst [vmem:[%s4201_s23 + $0x98] sm:$0xff] %v4406_v1  ;;  %v4411_v57 = vadd.f32 %v4175_v21, %v1911_v59 }
 0x337   : > { %1957 = vst [vmem:[%s4201_s23 + $0xc8] sm:$0xff] %v4411_v57 }
 0x33d   : > { %v1875_v46 = vpop.f32.mrf.mxu1 }
 0x33e   : > { %v1876_v62 = vadd.f32 %v4175_v21, %v1875_v46 }
 0x340   : > { %1945 = vst [vmem:[%s4201_s23 + $0x68] sm:$0xff] %v1876_v62 }
 0x344   : > { %v1857_v15 = vpop.f32.mrf.mxu0 }
 0x345   : > { %v1858_v23 = vadd.f32 %v4175_v21, %v1857_v15 }
 0x347   : > { %1939 = vst [vmem:[%s4201_s23 + $0x38] sm:$0xff] %v1858_v23  ;;  %v1970_v29 = vadd.f32 %v1969_v2, %v1858_v23  ;;  %v2009_v60 = vmul.f32 %v1858_v23, %v1858_v23 }
 0x349   : > { %v1971_v50 = vadd.f32 %v1970_v29, %v4225_v49  ;;  %v2040_v6 = vadd.f32 %v2039_v19, %v2009_v60  ;;  %v2021_v19 = vmul.f32 %v4406_v1, %v4406_v1 }
 0x34b   : > { %v1972_v27 = vadd.f32 %v1971_v50, %v4240_v56  ;;  %v2041_v40 = vadd.f32 %v2040_v6, %v2010_v4  ;;  %v2015_v56 = vmul.f32 %v1876_v62, %v1876_v62 }
 0x34d   : > { %v1973_v16 = vadd.f32 %v1972_v27, %v4272_v55  ;;  %v2042_v63 = vadd.f32 %v2041_v40, %v2011_v8  ;;  %v2026_v40 = vmul.f32 %v4343_v17, %v4343_v17 }
 0x34f   : > { %v2043_v43 = vadd.f32 %v2042_v63, %v2012_v47  ;;  %v1974_v49 = vadd.f32 %v1973_v16, %v4333_v18  ;;  %v2027_v63 = vmul.f32 %v4411_v57, %v4411_v57 }
 0x351   : > { %v1975_v34 = vadd.f32 %v1974_v49, %v1873_v45  ;;  %v2044_v37 = vadd.f32 %v2043_v43, %v2013_v39 }
 0x353   : > { %v1976_v13 = vadd.f32 %v1975_v34, %v1876_v62  ;;  %v2045_v51 = vadd.f32 %v2044_v37, %v2014_v30 }
 0x354   : > { %v1896_v22 = vpop.f32.mrf.mxu2 }
 0x355   : > { %v1897_v55 = vadd.f32 %v4175_v21, %v1896_v22  ;;  %v2046_v48 = vadd.f32 %v2045_v51, %v2015_v56 }
 0x357   : > { %1952 = vst [vmem:[%s4201_s23 + $0xa0] sm:$0xff] %v1897_v55  ;;  %v2022_v32 = vmul.f32 %v1897_v55, %v1897_v55 }
 0x35b   : > { %v1914_v14 = vpop.f32.mrf.mxu3 }
 0x35c   : > { %v1915_v38 = vadd.f32 %v4175_v21, %v1914_v14 }
 0x35e   : > { %1958 = vst [vmem:[%s4201_s23 + $0xd0] sm:$0xff] %v1915_v38  ;;  %v2028_v34 = vmul.f32 %v1915_v38, %v1915_v38 }
 0x365   : > { %v1878_v18 = vpop.f32.mrf.mxu1 }
 0x366   : > { %v1879_v61 = vadd.f32 %v4175_v21, %v1878_v18 }
 0x368   : > { %1946 = vst [vmem:[%s4201_s23 + $0x70] sm:$0xff] %v1879_v61  ;;  %v2016_v31 = vmul.f32 %v1879_v61, %v1879_v61  ;;  %v1977_v45 = vadd.f32 %v1976_v13, %v1879_v61 }
 0x36a   : > { %v2047_v58 = vadd.f32 %v2046_v48, %v2016_v31 }
 0x372   : > { %v1917_v7 = vpop.f32.mrf.mxu3 }
 0x373   : > { %v1899_v26 = vpop.f32.mrf.mxu2  ;;  %v1918_v3 = vadd.f32 %v4175_v21, %v1917_v7 }
 0x374   : > { %v1900_v11 = vadd.f32 %v4175_v21, %v1899_v26 }
 0x375   : > { %1959 = vst [vmem:[%s4201_s23 + $0xd8] sm:$0xff] %v1918_v3  ;;  %v2029_v51 = vmul.f32 %v1918_v3, %v1918_v3 }
 0x376   : > { %1953 = vst [vmem:[%s4201_s23 + $0xa8] sm:$0xff] %v1900_v11 }
 0x37c   : > { %v1881_v44 = vpop.f32.mrf.mxu1 }
 0x37d   : > { %v1882_v42 = vadd.f32 %v4175_v21, %v1881_v44 }
 0x37f   : > { %1947 = vst [vmem:[%s4201_s23 + $0x78] sm:$0xff] %v1882_v42  ;;  %v1978_v53 = vadd.f32 %v1977_v45, %v1882_v42  ;;  %v2017_v54 = vmul.f32 %v1882_v42, %v1882_v42 }
 0x381   : > { %v1979_v35 = vadd.f32 %v1978_v53, %v4267_v52  ;;  %v2048_v41 = vadd.f32 %v2047_v58, %v2017_v54 }
 0x383   : > { %v1980_v5 = vadd.f32 %v1979_v35, %v4303_v12  ;;  %v2049_v2 = vadd.f32 %v2048_v41, %v2018_v28 }
 0x385   : > { %v1981_v10 = vadd.f32 %v1980_v5, %v4346_v0  ;;  %v2050_v33 = vadd.f32 %v2049_v2, %v2019_v20  ;;  %v2023_v0 = vmul.f32 %v1900_v11, %v1900_v11 }
 0x387   : > { %v2051_v24 = vadd.f32 %v2050_v33, %v2020_v36  ;;  %v1982_v52 = vadd.f32 %v1981_v10, %v4406_v1 }
 0x389   : > { %v1983_v25 = vadd.f32 %v1982_v52, %v1897_v55  ;;  %v2052_v9 = vadd.f32 %v2051_v24, %v2021_v19 }
 0x38a   : > { %v1902_v59 = vpop.f32.mrf.mxu2 }
 0x38b   : > { %v1903_v12 = vadd.f32 %v4175_v21, %v1902_v59  ;;  %v2053_v46 = vadd.f32 %v2052_v9, %v2022_v32  ;;  %v1984_v23 = vadd.f32 %v1983_v25, %v1900_v11 }
 0x38c   : > { %v1920_v62 = vpop.f32.mrf.mxu3 }
 0x38d   : > { %1954 = vst [vmem:[%s4201_s23 + $0xb0] sm:$0xff] %v1903_v12  ;;  %v1921_v15 = vadd.f32 %v4175_v21, %v1920_v62  ;;  %v2024_v29 = vmul.f32 %v1903_v12, %v1903_v12  ;;  %v2054_v60 = vadd.f32 %v2053_v46, %v2023_v0  ;;  %v1985_v50 = vadd.f32 %v1984_v23, %v1903_v12 }
 0x38f   : > { %1960 = vst [vmem:[%s4201_s23 + $0xe0] sm:$0xff] %v1921_v15  ;;  %v2055_v6 = vadd.f32 %v2054_v60, %v2024_v29  ;;  %v2030_v48 = vmul.f32 %v1921_v15, %v1921_v15 }
 0x39c   : > { %v1905_v4 = vpop.f32.mrf.mxu2 }
 0x39d   : > { %v1906_v1 = vadd.f32 %v4175_v21, %v1905_v4 }
 0x39f   : > { %1955 = vst [vmem:[%s4201_s23 + $0xb8] sm:$0xff] %v1906_v1  ;;  %v1986_v8 = vadd.f32 %v1985_v50, %v1906_v1  ;;  %v2025_v27 = vmul.f32 %v1906_v1, %v1906_v1 }
 0x3a1   : > { %v1987_v47 = vadd.f32 %v1986_v8, %v4343_v17  ;;  %v2056_v16 = vadd.f32 %v2055_v6, %v2025_v27 }
 0x3a3   : > { %v1988_v39 = vadd.f32 %v1987_v47, %v4411_v57  ;;  %v2057_v43 = vadd.f32 %v2056_v16, %v2026_v40  ;;  %v1923_v49 = vpop.f32.mrf.mxu3 }
 0x3a4   : > { %v1924_v30 = vadd.f32 %v4175_v21, %v1923_v49 }
 0x3a5   : > { %v2058_v37 = vadd.f32 %v2057_v43, %v2027_v63  ;;  %v1989_v56 = vadd.f32 %v1988_v39, %v1915_v38 }
 0x3a6   : > { %1961 = vst [vmem:[%s4201_s23 + $0xe8] sm:$0xff] %v1924_v30  ;;  %v2031_v61 = vmul.f32 %v1924_v30, %v1924_v30 }
 0x3a7   : > { %v2059_v13 = vadd.f32 %v2058_v37, %v2028_v34  ;;  %v1990_v17 = vadd.f32 %v1989_v56, %v1918_v3 }
 0x3a9   : > { %v2060_v22 = vadd.f32 %v2059_v13, %v2029_v51  ;;  %v1991_v14 = vadd.f32 %v1990_v17, %v1921_v15 }
 0x3ab   : > { %v1926_v55 = vpop.f32.mrf.mxu3  ;;  %v2061_v18 = vadd.f32 %v2060_v22, %v2030_v48  ;;  %v1992_v38 = vadd.f32 %v1991_v14, %v1924_v30 }
 0x3ac   : > { %v1927_v57 = vadd.f32 %v4175_v21, %v1926_v55 }
 0x3ad   : > { %v2062_v7 = vadd.f32 %v2061_v18, %v2031_v61 }
 0x3ae   : > { %1962 = vst [vmem:[%s4201_s23 + $0xf0] sm:$0xff] %v1927_v57  ;;  %v2032_v26 = vmul.f32 %v1927_v57, %v1927_v57  ;;  %v1993_v11 = vadd.f32 %v1992_v38, %v1927_v57 }
 0x3b0   : > { %v2063_v44 = vadd.f32 %v2062_v7, %v2032_v26 }
 0x3b3   : > { %v1929_v3 = vpop.f32.mrf.mxu3 }
 0x3b4   : > { %v1930_v31 = vadd.f32 %v4175_v21, %v1929_v3 }
 0x3b6   : > { %1963 = vst [vmem:[%s4201_s23 + $0xf8] sm:$0xff] %v1930_v31  ;;  %v1994_v45 = vadd.f32 %v1993_v11, %v1930_v31  ;;  %v2033_v42 = vmul.f32 %v1930_v31, %v1930_v31 }
 0x3b7   : > { %2385 = shalt.err (!%p2382_p3)
}
 0x3b8   : > { %s2490_s23 = smov 128   ;;  %v1995_v21 = vrot.slane %v1994_v45, 4  ;;  %v2064_v58 = vadd.f32 %v2063_v44, %v2033_v42  ;;  %s2107_s18 = scalar_lea.hbm %s4564_s6, %s2552_s26 }
 0x3b9   : > { %2299 = dma.vmem_to_hbm [thread:$0]  (%p2571_p5), %s2094_s14, 4096, %s2096_s15, %s2073_s16, %s2490_s23, %s2490_s23, %s2483_s17  }
 0x3ba   : > { %v1996_v53 = vadd.f32 %v1995_v21, %v1994_v45  ;;  %v2065_v54 = vrot.slane %v2064_v58, 4  ;;  %s2077_s19 = sand.u32 1, %s2552_s26   ;;  %s2120_s11 = scalar_lea.hbm %s4565_s7, %s2552_s26 }
 0x3bb   : > { %s281_s20 = scalar_lea.vmem [#allocation4], %s4159_s29  ;;  %s4502_s14 = sshll.u32 %s2107_s18, 4  ;;  %s2112_s14 = int_to_ptr.hbm [resolvable:$true] %s4502_s14 }
 0x3bc   : > { %v1997_v28 = vrot.slane %v1996_v53, 2  ;;  %v2066_v35 = vadd.f32 %v2065_v54, %v2064_v58  ;;  %s4500_s17 = sshll.u32 %s281_s20, 4  ;;  %s287_s15 = scalar_lea.vmem [#allocation6], %s4159_s29  ;;  %s2110_s17 = int_to_ptr.vmem [resolvable:$true] %s4500_s17 }
 0x3bd   : > { %s4505_s16 = sshll.u32 %s287_s15, 4  ;;  %s4507_s22 = sshll.u32 %s2120_s11, 4  ;;  %s2123_s16 = int_to_ptr.vmem [resolvable:$true] %s4505_s16  ;;  %s2125_s22 = int_to_ptr.hbm [resolvable:$true] %s4507_s22 }
 0x3be   : > { %v2067_v41 = vrot.slane %v2066_v35, 2  ;;  %v1998_v20 = vadd.f32 %v1997_v28, %v1996_v53  ;;  %s2078_s26 = scalar_lea.sflag [#allocation5], %s2077_s19  ;;  %s2400_s23 = sshra.s32 %s2112_s14, 4  ;;  %s2401_s23 = int_to_ptr.hbm [resolvable:$true] %s2400_s23 }
 0x3bf   : > { %s2402_s12 = scalar_lea.hbm %s2401_s23, 1  ;;  %s2406_s18 = scalar_lea.hbm %s4564_s6, 2 }
 0x3c0   : > { %v1999_v5 = vrot.slane %v1998_v20, 1  ;;  %v2068_v2 = vadd.f32 %v2067_v41, %v2066_v35  ;;  %p2403_p4 = scmp.ne.s32.totalorder %s2401_s23, %s2402_s12  ;;  %p2407_p9 = scmp.lt.s32.totalorder %s2401_s23, %s4564_s6 }
 0x3c1   : > { %p2408_p10 = scmp.lt.s32.totalorder %s2406_s18, %s2402_s12 }
 0x3c2   : > { %v2000_v36 = vadd.f32 %v1999_v5, %v1998_v20  ;;  %v2069_v10 = vrot.slane %v2068_v2, 1  ;;  %p2404_p7 = pnand %p2403_p4, %p2571_p5 }
 0x3c3   : > { %p2409_p11 = por %p2408_p10, %p2407_p9 }
 0x3c4   : > { %2001 = vst [vmem:[%s281_s20] sm:$0x1] %v2000_v36  ;;  %v2070_v33 = vadd.f32 %v2069_v10, %v2068_v2  ;;  %p2405_p8 = pneg %p2404_p7 }
 0x3c6   : > { %p2410_p12 = pnand %p2409_p11, %p2405_p8 }
 0x3c8   : > { %2413 = shalt.err (!%p2410_p12)
}
 0x3c9   : > { %2300 = dma.vmem_to_hbm [thread:$0]  (%p2571_p5), %s2110_s17, 16, %s2112_s14, %s2078_s26   ;;  %2071 = vst [vmem:[%s287_s15] sm:$0x1] %v2070_v33 }
 0x3ca   : > { %s2428_s19 = sshra.s32 %s2125_s22, 4  ;;  %s2434_s12 = scalar_lea.hbm %s4565_s7, 2  ;;  %s2429_s19 = int_to_ptr.hbm [resolvable:$true] %s2428_s19 }
 0x3cb   : > { %s2430_s11 = scalar_lea.hbm %s2429_s19, 1  ;;  %p2435_p2 = scmp.lt.s32.totalorder %s2429_s19, %s4565_s7 }
 0x3cc   : > { %p2431_p13 = scmp.ne.s32.totalorder %s2429_s19, %s2430_s11  ;;  %p2436_p3 = scmp.lt.s32.totalorder %s2434_s12, %s2430_s11 }
 0x3ce   : > { %p2432_p0 = pnand %p2431_p13, %p2571_p5  ;;  %p2437_p4 = por %p2436_p3, %p2435_p2 }
 0x3d0   : > { %p2433_p1 = pneg %p2432_p0 }
 0x3d2   : > { %p2438_p7 = pnand %p2437_p4, %p2433_p1 }
 0x3d4   : > { %2441 = shalt.err (!%p2438_p7)
}
 0x3d5   : > { %2301 = dma.vmem_to_hbm [thread:$0]  (%p2571_p5), %s2123_s16, 16, %s2125_s22, %s2078_s26  }
 0x3d6 PF: > { %p2315_p8 = scmp.ge.s32.totalorder %s2480_s4, 2  ;;  %s2136_s17 = sand.u32 1, %s2468_s24  }
 0x3d7   : > { %s2137_s14 = scalar_lea.sflag [#allocation3], %s2136_s17 }
 0x3d8   : > { %p2306_p9 = pnand %p2315_p8, %p2575_p6 }
 0x3da   : > { %p2307_p10 = pneg %p2306_p9 }
 0x3dc   : > { %2459 = dma.done.wait (%p2307_p10), %s2137_s14, 4096  }
 0x3dd   : > { %2461 = vsyncadd (%p2307_p10), %s2137_s14, 4294963200  ;;  %s2146_s9 = sand.u32 1, %s2237_s27  }
 0x3de   : > { %s2147_s15 = scalar_lea.sflag [#allocation5], %s2146_s9 }
 0x3df   : > { %2463 = dma.done.wait (%p2307_p10), %s2147_s15, 32  }
 0x3e0   : > { %2465 = vsyncadd (%p2307_p10), %s2147_s15, 4294967264  ;;  %p21_p5 = scmp.ge.s32.totalorder %s2556_s28, 4   ;;  %s5029_s24 = smov %s2472_s25 }
 0x3e1   : > { %s5030_s25 = smov %s2476_s3  ;;  %s5031_s3 = smov %s2569_s8 }
 0x3e2   : > { %s5032_s4 = smov %s2556_s28  ;;  %23 = sbr.rel (!%p21_p5) target bundleno = 5 (0x5), region = 107 }
 0x3e7   :  { %2161 = vsyncpa [#allocation3], 1 }
 0x3e8   :  { %2163 = vsyncpa [#allocation3 + $0x1], 1 }
 0x3e9   :  { %2164 = vsyncpa [#allocation5], 1 }
 0x3ea   :  { %2166 = vsyncpa [#allocation5 + $0x1], 1 }

</bundles_post_ra>
